<compile_context>
chip_gen: v7x
topology: tpu7x:2x2x1
jax: 0.10.0
libtpu: 0.0.40
codegen_flags: <defaults>
</compile_context>

<pallas_src>
import functools
import math

import jax
import jax.numpy as jnp
from jax.experimental import pallas as pl
from jax.experimental.pallas import tpu as pltpu


def _round_up(x, m):
    return (x + m - 1) // m * m


def _lcm(a, b):
    return a * b // math.gcd(a, b)


def _conv_relu_kernel(cur_ref, nxt_ref, w_ref, b_ref, o_ref, *, KH, KW, Wo):
    # cur_ref: (1, TH,   Wp8, Cin)  bf16 -- padded input rows [i*TH, i*TH+TH)
    # nxt_ref: (1, halo, Wp8, Cin)  bf16 -- halo rows [(i+1)*TH, (i+1)*TH+halo)
    # w_ref:   (KH, KW*Cin, Cout)   bf16 -- taps indexed on the leading dim
    # b_ref:   (1, Cout)            f32
    # o_ref:   (1, TH, Wo*Cout)     f32  -- lane-dense output slab
    _, TH, Wp8, Cin = cur_ref.shape
    Cout = w_ref.shape[2]
    rows = TH + KH - 1

    # Assemble the TH + (KH-1) input rows for this tile (leading-axis concat).
    cur = cur_ref[0].astype(jnp.float32)                      # (TH, Wp8, Cin)
    if KH > 1:
        halo = nxt_ref[0].astype(jnp.float32)                 # (KH-1, Wp8, Cin)
        xs = jnp.concatenate([cur, halo], axis=0)             # (rows, Wp8, Cin)
    else:
        xs = cur
    # Wp8 % 8 == 0 -> this collapse is layout-preserving (no relayout copy).
    xs = xs.reshape(rows * Wp8, Cin)

    # Merge the KW horizontal taps into the channel axis (im2col along W).
    # The column shift dw is a static sublane rotation (XLU) -- no strided
    # slices.  Wrap-around only touches the padded columns that are discarded.
    n = rows * Wp8
    cols = [xs if dw == 0 else pltpu.roll(xs, n - dw, axis=0)
            for dw in range(KW)]
    xcat = jnp.concatenate(cols, axis=-1)                     # (rows*Wp8, KW*Cin)

    # KH fat matmuls, K = KW*Cin, bf16 inputs, f32 accumulation on the MXU.
    acc = jnp.zeros((TH * Wp8, Cout), dtype=jnp.float32)
    for dh in range(KH):
        patch = xcat[dh * Wp8:(dh + TH) * Wp8, :]             # 8-aligned slice
        acc = acc + jnp.dot(patch.astype(jnp.bfloat16), w_ref[dh],
                            preferred_element_type=jnp.float32)

    acc = jnp.maximum(acc + b_ref[...], 0.0)                  # bias + ReLU (f32)

    # Single repack at the end: drop padded columns, store lane-dense.
    out = acc.reshape(TH, Wp8, Cout)[:, :Wo, :]
    o_ref[...] = out.reshape(1, TH, Wo * Cout).astype(o_ref.dtype)


def _pick_tile_rows(Ho, halo, Wp8, Cin, Cout, KW, budget_bytes=6 << 20):
    """Largest H-tile (multiple of lcm(8, halo)) whose working set fits budget."""
    unit = _lcm(8, halo)
    per_row = (Wp8 * Cin * 2 * 2          # bf16 input block, double buffered
               + Wp8 * Cin * 4            # f32 upcast of assembled rows
               + Wp8 * KW * Cin * 4       # im2col tile (xcat)
               + Wp8 * Cout * 4           # f32 accumulator
               + Wp8 * Cout * 4 * 2)      # f32 output block, double buffered
    th = (budget_bytes // max(per_row, 1)) // unit * unit
    th = max(unit, th)
    th = min(th, max(unit, (512 // unit) * unit))   # soft cap on tile height
    th = min(th, _round_up(Ho, unit))               # no taller than the image
    return th


def conv_block_forward(x_nchw, weight_oihw, bias, *, stride=1, padding=1):
    """ConvBlock forward: ReLU(Conv2d(x)), stride 1.  NCHW in / NCHW out."""
    if stride != 1:
        # TODO(synk): strided conv not implemented in this kernel.
        raise NotImplementedError("stride != 1 is not supported")

    B, Cin, H, W = x_nchw.shape
    Cout, Cin_w, KH, KW = weight_oihw.shape
    assert Cin == Cin_w

    Ho = H + 2 * padding - KH + 1
    Wo = W + 2 * padding - KW + 1
    assert Ho > 0 and Wo > 0

    halo = max(KH - 1, 1)
    Wp8 = _round_up(W + 2 * padding, 8)   # pad W so (H,W) collapses are free
    TH = _pick_tile_rows(Ho, halo, Wp8, Cin, Cout, KW)
    Ho_pad = _round_up(Ho, TH)
    nH = Ho_pad // TH
    Hp = Ho_pad + halo                    # rows incl. bottom halo of last tile

    # ---- wrapper-side glue (XLA): layout + zero padding + bf16 cast ----
    # TODO(synk): in a multi-layer network keep activations NHWC/bf16 between
    # ConvBlocks to avoid these transpose passes over HBM.
    x_nhwc = jnp.transpose(x_nchw, (0, 2, 3, 1)).astype(jnp.bfloat16)
    x_pad = jnp.pad(x_nhwc, ((0, 0),
                             (padding, Hp - H - padding),
                             (padding, Wp8 - W - padding),
                             (0, 0)))                         # (B, Hp, Wp8, Cin)

    # (Cout, Cin, KH, KW) -> (KH, KW, Cin, Cout) -> (KH, KW*Cin, Cout)
    w_mat = jnp.transpose(weight_oihw, (2, 3, 1, 0)).reshape(KH, KW * Cin, Cout)
    w_mat = w_mat.astype(jnp.bfloat16)
    b_mat = bias.reshape(1, Cout).astype(jnp.float32)

    kernel = functools.partial(_conv_relu_kernel, KH=KH, KW=KW, Wo=Wo)

    out = pl.pallas_call(
        kernel,
        out_shape=jax.ShapeDtypeStruct((B, Ho_pad, Wo * Cout), jnp.float32),
        grid_spec=pltpu.PrefetchScalarGridSpec(
            num_scalar_prefetch=0,
            grid=(B, nH),
            in_specs=[
                # current TH padded input rows of this tile
                pl.BlockSpec((1, TH, Wp8, Cin), lambda b, i: (b, i, 0, 0)),
                # (KH-1)-row bottom halo (same array, tiny extra fetch)
                pl.BlockSpec((1, halo, Wp8, Cin),
                             lambda b, i: (b, (i + 1) * (TH // halo), 0, 0)),
                # weights / bias: constant across the grid (block revisited)
                pl.BlockSpec((KH, KW * Cin, Cout), lambda b, i: (0, 0, 0)),
                pl.BlockSpec((1, Cout), lambda b, i: (0, 0)),
            ],
            out_specs=pl.BlockSpec((1, TH, Wo * Cout), lambda b, i: (b, i, 0)),
        ),
        compiler_params=pltpu.CompilerParams(
            dimension_semantics=("parallel", "parallel"),
            vmem_limit_bytes=32 * 1024 * 1024),
    )(x_pad, x_pad, w_mat, b_mat)

    out = out[:, :Ho, :].reshape(B, Ho, Wo, Cout)
    return jnp.transpose(out, (0, 3, 1, 2))                   # back to NCHW


if __name__ == "__main__":
    # Deterministic small-shape example consistent with ConvBlock(in=4, out=8).
    key = jax.random.PRNGKey(0)
    kx, kw, kb = jax.random.split(key, 3)

    B, Cin, H, W = 2, 4, 16, 16
    Cout, KH, KW = 8, 3, 3

    x = jax.random.normal(kx, (B, Cin, H, W), dtype=jnp.float32)
    # PyTorch Conv2d weight layout: (out_channels, in_channels, kH, kW)
    weight = jax.random.normal(kw, (Cout, Cin, KH, KW), dtype=jnp.float32) * 0.1
    bias = jax.random.normal(kb, (Cout,), dtype=jnp.float32) * 0.1

    out = conv_block_forward(x, weight, bias, padding=1)
    out = jax.block_until_ready(out)

    # Reference: XLA conv in f32 (kernel runs activations/weights in bf16,
    # f32 accumulate -> loosened tolerance).
    ref = jax.lax.conv_general_dilated(
        x, weight, window_strides=(1, 1), padding=((1, 1), (1, 1)),
        dimension_numbers=("NCHW", "OIHW", "NCHW"))
    ref = jnp.maximum(ref + bias[None, :, None, None], 0.0)

    assert out.shape == (B, Cout, H, W)
    assert jnp.allclose(out, ref, atol=5e-2, rtol=5e-2)
    print("KERNEL_OK")
</pallas_src>

<mosaic_0001>
module attributes {stable_mosaic.version = 11 : i64} {
  func.func @_conv_relu_kernel(%arg0: i32, %arg1: i32, %arg2: memref<1x16x24x4xbf16, #tpu.memory_space<vmem>>, %arg3: memref<1x2x24x4xbf16, #tpu.memory_space<vmem>>, %arg4: memref<3x12x8xbf16, #tpu.memory_space<vmem>>, %arg5: memref<1x8xf32, #tpu.memory_space<vmem>>, %arg6: memref<1x16x128xf32, #tpu.memory_space<vmem>>) attributes {dimension_semantics = [#tpu.dimension_semantics<parallel>, #tpu.dimension_semantics<parallel>], iteration_bounds = array<i64: 2, 1>, scalar_prefetch = 0 : i64, scratch_operands = 0 : i64, tpu.core_type = #tpu.core_type<tc>, window_params = [{transform_indices = @transform_0, window_bounds = array<i64: 1, 16, 24, 4>}, {transform_indices = @transform_1, window_bounds = array<i64: 1, 2, 24, 4>}, {pipeline_mode = #tpu.pipeline_mode<synchronous>, transform_indices = @transform_2, window_bounds = array<i64: 3, 12, 8>}, {pipeline_mode = #tpu.pipeline_mode<synchronous>, transform_indices = @transform_3, window_bounds = array<i64: 1, 8>}, {transform_indices = @transform_4, window_bounds = array<i64: 1, 16, 128>}]} {
    %c0 = arith.constant 0 : index
    %c0_0 = arith.constant 0 : index
    %c0_1 = arith.constant 0 : index
    %c0_2 = arith.constant 0 : index
    %0 = vector.load %arg2[%c0, %c0_0, %c0_1, %c0_2] : memref<1x16x24x4xbf16, #tpu.memory_space<vmem>>, vector<1x16x24x4xbf16>
    %1 = vector.shape_cast %0 : vector<1x16x24x4xbf16> to vector<16x24x4xbf16>
    %2 = arith.extf %1 : vector<16x24x4xbf16> to vector<16x24x4xf32>
    %c0_3 = arith.constant 0 : index
    %c0_4 = arith.constant 0 : index
    %c0_5 = arith.constant 0 : index
    %c0_6 = arith.constant 0 : index
    %3 = vector.load %arg3[%c0_3, %c0_4, %c0_5, %c0_6] : memref<1x2x24x4xbf16, #tpu.memory_space<vmem>>, vector<1x2x24x4xbf16>
    %4 = vector.shape_cast %3 : vector<1x2x24x4xbf16> to vector<2x24x4xbf16>
    %5 = arith.extf %4 : vector<2x24x4xbf16> to vector<2x24x4xf32>
    %6 = tpu.concatenate %2, %5 in 0 : vector<16x24x4xf32>, vector<2x24x4xf32> -> vector<18x24x4xf32>
    %7 = vector.shape_cast %6 : vector<18x24x4xf32> to vector<432x4xf32>
    %c431_i32 = arith.constant 431 : i32
    %8 = tpu.dynamic_rotate %7 by %c431_i32 dim 0 : vector<432x4xf32>, i32 -> vector<432x4xf32>
    %c430_i32 = arith.constant 430 : i32
    %9 = tpu.dynamic_rotate %7 by %c430_i32 dim 0 : vector<432x4xf32>, i32 -> vector<432x4xf32>
    %10 = tpu.concatenate %7, %8, %9 in 1 : vector<432x4xf32>, vector<432x4xf32>, vector<432x4xf32> -> vector<432x12xf32>
    %cst = arith.constant 0.000000e+00 : f32
    %11 = vector.broadcast %cst : f32 to vector<384x8xf32>
    %12 = vector.extract_strided_slice %10 {offsets = [0, 0], sizes = [384, 12], strides = [1, 1]} : vector<432x12xf32> to vector<384x12xf32>
    %13 = arith.truncf %12 : vector<384x12xf32> to vector<384x12xbf16>
    %c0_7 = arith.constant 0 : index
    %c0_8 = arith.constant 0 : index
    %c0_9 = arith.constant 0 : index
    %14 = vector.load %arg4[%c0_7, %c0_8, %c0_9] : memref<3x12x8xbf16, #tpu.memory_space<vmem>>, vector<1x12x8xbf16>
    %15 = vector.shape_cast %14 : vector<1x12x8xbf16> to vector<12x8xbf16>
    %cst_10 = arith.constant dense<0.000000e+00> : vector<384x8xf32>
    %16 = tpu.matmul %13, %15, %cst_10 {dimension_numbers = #tpu.dot_dimension_numbers<[1], [0], [0], [1], [0, 0, 1, 1], [], []>} : vector<384x12xbf16>, vector<12x8xbf16>, vector<384x8xf32> -> vector<384x8xf32>
    %17 = arith.addf %11, %16 : vector<384x8xf32>
    %18 = vector.extract_strided_slice %10 {offsets = [24, 0], sizes = [384, 12], strides = [1, 1]} : vector<432x12xf32> to vector<384x12xf32>
    %19 = arith.truncf %18 : vector<384x12xf32> to vector<384x12xbf16>
    %c1 = arith.constant 1 : index
    %c0_11 = arith.constant 0 : index
    %c0_12 = arith.constant 0 : index
    %20 = vector.load %arg4[%c1, %c0_11, %c0_12] : memref<3x12x8xbf16, #tpu.memory_space<vmem>>, vector<1x12x8xbf16>
    %21 = vector.shape_cast %20 : vector<1x12x8xbf16> to vector<12x8xbf16>
    %cst_13 = arith.constant dense<0.000000e+00> : vector<384x8xf32>
    %22 = tpu.matmul %19, %21, %cst_13 {dimension_numbers = #tpu.dot_dimension_numbers<[1], [0], [0], [1], [0, 0, 1, 1], [], []>} : vector<384x12xbf16>, vector<12x8xbf16>, vector<384x8xf32> -> vector<384x8xf32>
    %23 = arith.addf %17, %22 : vector<384x8xf32>
    %24 = vector.extract_strided_slice %10 {offsets = [48, 0], sizes = [384, 12], strides = [1, 1]} : vector<432x12xf32> to vector<384x12xf32>
    %25 = arith.truncf %24 : vector<384x12xf32> to vector<384x12xbf16>
    %c2 = arith.constant 2 : index
    %c0_14 = arith.constant 0 : index
    %c0_15 = arith.constant 0 : index
    %26 = vector.load %arg4[%c2, %c0_14, %c0_15] : memref<3x12x8xbf16, #tpu.memory_space<vmem>>, vector<1x12x8xbf16>
    %27 = vector.shape_cast %26 : vector<1x12x8xbf16> to vector<12x8xbf16>
    %cst_16 = arith.constant dense<0.000000e+00> : vector<384x8xf32>
    %28 = tpu.matmul %25, %27, %cst_16 {dimension_numbers = #tpu.dot_dimension_numbers<[1], [0], [0], [1], [0, 0, 1, 1], [], []>} : vector<384x12xbf16>, vector<12x8xbf16>, vector<384x8xf32> -> vector<384x8xf32>
    %29 = arith.addf %23, %28 : vector<384x8xf32>
    %c0_17 = arith.constant 0 : index
    %c0_18 = arith.constant 0 : index
    %30 = vector.load %arg5[%c0_17, %c0_18] : memref<1x8xf32, #tpu.memory_space<vmem>>, vector<1x8xf32>
    %31 = vector.broadcast %30 : vector<1x8xf32> to vector<384x8xf32>
    %32 = arith.addf %29, %31 : vector<384x8xf32>
    %cst_19 = arith.constant 0.000000e+00 : f32
    %33 = vector.broadcast %cst_19 : f32 to vector<384x8xf32>
    %34 = arith.maximumf %32, %33 : vector<384x8xf32>
    %35 = vector.shape_cast %34 : vector<384x8xf32> to vector<16x24x8xf32>
    %36 = vector.extract_strided_slice %35 {offsets = [0, 0, 0], sizes = [16, 16, 8], strides = [1, 1, 1]} : vector<16x24x8xf32> to vector<16x16x8xf32>
    %37 = vector.shape_cast %36 : vector<16x16x8xf32> to vector<1x16x128xf32>
    %c0_20 = arith.constant 0 : index
    %c0_21 = arith.constant 0 : index
    %c0_22 = arith.constant 0 : index
    %38 = vector.load %arg6[%c0_20, %c0_21, %c0_22] : memref<1x16x128xf32, #tpu.memory_space<vmem>>, vector<1x16x128xf32>
    tpu.vector_store %arg6[%c0_20, %c0_21, %c0_22], %37 {strides = array<i32>} : memref<1x16x128xf32, #tpu.memory_space<vmem>>, vector<1x16x128xf32>,
    return
  }
  func.func @transform_0(%arg0: i32, %arg1: i32) -> (i32, i32, i32, i32) {
    %c0_i32 = arith.constant 0 : i32
    %c0_i32_0 = arith.constant 0 : i32
    %c0_i32_1 = arith.constant 0 : i32
    return %arg0, %arg1, %c0_i32, %c0_i32_0 : i32, i32, i32, i32
  }
  func.func @transform_1(%arg0: i32, %arg1: i32) -> (i32, i32, i32, i32) {
    %c1_i32 = arith.constant 1 : i32
    %0 = arith.addi %arg1, %c1_i32 : i32
    %c8_i32 = arith.constant 8 : i32
    %1 = arith.muli %0, %c8_i32 : i32
    %c0_i32 = arith.constant 0 : i32
    %c0_i32_0 = arith.constant 0 : i32
    %c0_i32_1 = arith.constant 0 : i32
    return %arg0, %1, %c0_i32, %c0_i32_0 : i32, i32, i32, i32
  }
  func.func @transform_2(%arg0: i32, %arg1: i32) -> (i32, i32, i32) {
    %c0_i32 = arith.constant 0 : i32
    %c0_i32_0 = arith.constant 0 : i32
    %c0_i32_1 = arith.constant 0 : i32
    %c0_i32_2 = arith.constant 0 : i32
    return %c0_i32, %c0_i32_0, %c0_i32_1 : i32, i32, i32
  }
  func.func @transform_3(%arg0: i32, %arg1: i32) -> (i32, i32) {
    %c0_i32 = arith.constant 0 : i32
    %c0_i32_0 = arith.constant 0 : i32
    %c0_i32_1 = arith.constant 0 : i32
    return %c0_i32, %c0_i32_0 : i32, i32
  }
  func.func @transform_4(%arg0: i32, %arg1: i32) -> (i32, i32, i32) {
    %c0_i32 = arith.constant 0 : i32
    %c0_i32_0 = arith.constant 0 : i32
    return %arg0, %arg1, %c0_i32 : i32, i32, i32
  }
}

</mosaic_0001>

<bundles_post_ra>
// kernel: tpu_custom_call.1
= control target key start
LH: loop header
LB: loop body
LE: loop exit
PB: predicated region body
PF: predicated region fallthrough
CT: control target
= control target key end

     0   :  { %9 = vsyncpa [#allocation3], 0  ;;  %s5506_s0 = inlined_call_operand.vmem [shape: bf16[2,18,24,4], index: 0, kind: input, shape index: {}]   ;;  %s5507_s1 = inlined_call_operand.vmem [shape: bf16[2,18,24,4], index: 1, kind: input, shape index: {}]   ;;  %s5508_s2 = inlined_call_operand.vmem [shape: bf16[3,12,8], index: 2, kind: input, shape index: {}]   ;;  %s5509_s3 = inlined_call_operand.vmem [shape: f32[1,8], index: 3, kind: input, shape index: {}]   ;;  %s5510_s4 = inlined_call_operand.hbm [shape: f32[2,16,128], index: 4, kind: output, shape index: {}]  }
   0x1   :  { %11 = vsyncpa [#allocation3 + $0x1], 0  ;;  %s3901_s15 = smov 0   ;;  %s3903_s16 = smov 0  }
   0x2   :  { %s3905_s17 = smov 0   ;;  %s3907_s18 = smov 0  }
   0x3   :  { %s3909_s19 = smov 0   ;;  %s3911_s20 = smov 0  }
   0x4 LB: > { %s2976_s21 = sadd.s32 4294967295, %s3854_s20   ;;  %s2977_s22 = sadd.s32 4294967294, %s3854_s20   ;;  %s3854_s20 = sphi %s3911_s20, %s17_s20   ;;  %s3850_s19 = sphi %s3909_s19, %s5580_s19   ;;  %s3846_s18 = sphi %s3907_s18, %s5579_s18   ;;  %s3842_s17 = sphi %s3905_s17, %s5578_s17   ;;  %s3838_s16 = sphi %s3903_s16, %s5577_s16   ;;  %s3834_s15 = sphi %s3901_s15, %s5576_s15  }
   0x5   : > { %s29_s23 = sadd.s32 1, %s3850_s19  ;;  %s140_s24 = sadd.s32 1, %s3842_s17 }
   0x6   : > { %p31_p0 = scmp.ge.s32.totalorder %s29_s23, 2  ;;  %p150_p1 = scmp.ne.s32.totalorder %s3842_s17, %s3838_s16 }
   0x7   : > { %p151_p2 = scmp.eq.s32.totalorder %s2976_s21, 1  ;;  %p156_p3 = scmp.ne.s32.totalorder %s3838_s16, %s3834_s15 }
   0x8   : > { %s5582_s23 = smov (%p31_p0, %s29_s23), 0  ;;  %p157_p5 = scmp.eq.s32.totalorder %s2977_s22, 1 }
   0x9   : > { %p3941_p4 = por %p151_p2, %p150_p1  ;;  %s135_s26 = ssub.s32 %s3850_s19, %s5582_s23 }
   0xa   : > { %p2980_p6 = scmp.ge.s32.totalorder %s3854_s20, 1  ;;  %p138_p7 = scmp.eq.s32.totalorder %s135_s26, 0 }
   0xb   : > { %p3948_p8 = por %p157_p5, %p156_p3  ;;  %p223_p9 = scmp.lt.s32.totalorder %s3854_s20, 3 }
   0xc   : > { %s3954_s28 = scalar_select %p138_p7, %s3842_s17, %s140_s24  }
   0xd   : > { %p224_p10 = pnand %p2980_p6, %p223_p9 }
   0xf   : > { %227 = sbr.rel (%p224_p10) target bundleno = 764 (0x2fc), region = 36 }
  0x16   : > { %p277_p11 = scmp.lt.s32.totalorder %s3846_s18, 1  ;;  %v471_v0 = vlaneseq  ;;  %s3856_s8 = smov 8   ;;  %vm1310_vm2 = vcmask 1045504   ;;  %vm1069_vm3 = vcmask 31744   ;;  %vm1124_vm4 = vcmask 64512  }
  0x17   : > { %s3857_s9 = smov 4   ;;  %vm1237_vm5 = vcmask 97280   ;;  %s3860_s6 = smov 64   ;;  %vm2813_vm6 = vcmask 130048   ;;  %vm2816_vm7 = vcmask 195584   ;;  %vm2819_vm8 = vcmask 261120  }
  0x18   : > { %s3958_s29 = scalar_select %p277_p11, %s3846_s18, 1  ;;  %v3960_v1 = vshrl.u32 %v471_v0, 7  ;;  %vm2822_vm9 = vcmask 326656   ;;  %vm2825_vm10 = vcmask 392192   ;;  %vm2828_vm11 = vcmask 457728  }
  0x19   : > { %s3864_s11 = smov 96   ;;  %s3865_s12 = smov 104   ;;  %vm2831_vm12 = vcmask 523264   ;;  %vm2834_vm13 = vcmask 588800   ;;  %vm2837_vm14 = vcmask 654336   ;;  %vm2840_vm15 = vcmask 719872  }
  0x1a   : > { %5536 = vst [vmem:[#allocation5_spill] sm:$0xff] %v3960_v1  ;;  %s3436_s30 = smul.u32 216, %s3958_s29  ;;  %vm582_vm0 = vcmp.lt.s32.totalorder %v3960_v1, 6  ;;  %vm473_vm1 = vcmp.lt.s32.totalorder %v3960_v1, 7  ;;  %s3867_s14 = smov 24  }
  0x1b   : > { %s3868_s21 = smov 32   ;;  %s3869_s22 = smov 40  }
  0x1c   : > { %s3968_s7 = scalar_lea.vmem %s5506_s0, %s3436_s30  ;;  %s3070_s10 = sadd.s32 192, %s3436_s30 }
  0x1d   : > { %v3971_v2 = vld [vmem:[%s3968_s7 + $0x68] sm:$0xff]   ;;  %v3193_v3 = vld [vmem:[%s3968_s7 + $0x70] sm:$0xff]   ;;  %v3194_v4 = vld [vmem:[%s3968_s7 + $0x78] sm:$0xff]   ;;  %s4373_s13 = scalar_lea.vmem %s5507_s1, %s3070_s10  ;;  %s3863_s10 = smov 88  }
  0x1e   : > { %v3977_v5 = vunpack.c.h.bf16 %v3971_v2  ;;  %v3979_v6 = vunpack.c.l.bf16 %v3193_v3  ;;  %v3981_v7 = vunpack.c.h.bf16 %v3193_v3  ;;  %v3985_v8 = vld [vmem:[%s3968_s7 + $0x8] sm:$0xff]   ;;  %v3181_v9 = vld [vmem:[%s3968_s7 + $0x10] sm:$0xff]   ;;  %v3988_v10 = vunpack.c.l.bf16 %v3194_v4  ;;  %v3182_v26 = vld [vmem:[%s3968_s7 + $0x18] sm:$0xff]   ;;  %s3870_s24 = smov 48   ;;  %s3871_s26 = smov 56  }
  0x1f   : > { %v3990_v11 = vunpack.c.h.bf16 %v3194_v4  ;;  %v3993_v12 = vunpack.c.h.bf16 %v3985_v8  ;;  %v3995_v13 = vunpack.c.l.bf16 %v3181_v9  ;;  %v4011_v24 = vunpack.c.h.bf16 %v3181_v9  ;;  %v3195_v43 = vld [vmem:[%s3968_s7 + $0x80] sm:$0xff]   ;;  %v3196_v56 = vld [vmem:[%s3968_s7 + $0x88] sm:$0xff]   ;;  %s3872_s29 = smov 112   ;;  %s3873_s30 = smov 120  }
  0x20   : > { %v5513_v14 = vrot.slane %v3977_v5, 2  ;;  %v556_v15 = vrot.slane %v3979_v6, 2  ;;  %v557_v16 = vrot.slane %v3981_v7, 2  ;;  %v5514_v17 = vrot.slane %v3977_v5, 1  ;;  %v3183_v61 = vld [vmem:[%s3968_s7 + $0x20] sm:$0xff]   ;;  %s268_s5 = sand.u32 1, %s3838_s16  }
  0x21   : > { %v445_v18 = vrot.slane %v3979_v6, 1  ;;  %v446_v19 = vrot.slane %v3981_v7, 1  ;;  %v447_v20 = vrot.slane %v3988_v10, 1  ;;  %v448_v21 = vrot.slane %v3990_v11, 1 }
  0x22   : > { %v607_v22 = vsel %vm582_vm0, %v556_v15, %v557_v16  ;;  %v608_v23 = vsel %vm582_vm0, %v5513_v14, %v556_v15  ;;  %v5512_v25 = vrot.slane %v3993_v12, 1  ;;  %v421_v33 = vrot.slane %v3995_v13, 1 }
  0x23   : > { %v3523_v27 = vpack.i.bf16 %v607_v22, %v608_v23  ;;  %v498_v28 = vsel %vm473_vm1, %v445_v18, %v446_v19  ;;  %v499_v29 = vsel %vm473_vm1, %v5514_v17, %v445_v18  ;;  %v496_v30 = vsel %vm473_vm1, %v447_v20, %v448_v21 }
  0x24   : > { %v3513_v31 = vpack.i.bf16 %v498_v28, %v499_v29  ;;  %v497_v32 = vsel %vm473_vm1, %v446_v19, %v447_v20  ;;  %v422_v34 = vrot.slane %v4011_v24, 1  ;;  %v558_v36 = vrot.slane %v3988_v10, 2  ;;  %v3184_v29 = vld [vmem:[%s3968_s7 + $0x28] sm:$0xff]  }
  0x25   : > { %3524 = vrot.lane.b32.xlu1 %v3523_v27, %s3856_s8  ;;  %v3518_v35 = vpack.i.bf16 %v496_v30, %v497_v32  ;;  %v559_v37 = vrot.slane %v3990_v11, 2  ;;  %v4032_v38 = vunpack.c.l.bf16 %v3182_v26  ;;  %v523_v40 = vsel %vm473_vm1, %v5512_v25, %v421_v33  ;;  %v3202_v25 = vld [vmem:[%s3968_s7 + $0xb8] sm:$0xff]  }
  0x26   : > { %3514 = vrot.lane.b32.xlu0 %v3513_v31, %s3857_s9  ;;  %v522_v39 = vsel %vm473_vm1, %v421_v33, %v422_v34  ;;  %v4041_v41 = vunpack.c.h.bf16 %v3182_v26  ;;  %v5511_v42 = vrot.slane %v3993_v12, 2  ;;  %v606_v46 = vsel %vm582_vm0, %v557_v16, %v558_v36 }
  0x27   : > { %v3528_v44 = vpack.i.bf16 %v522_v39, %v523_v40  ;;  %v605_v45 = vsel %vm582_vm0, %v558_v36, %v559_v37  ;;  %v423_v47 = vrot.slane %v4032_v38, 1  ;;  %v532_v50 = vrot.slane %v3995_v13, 2 }
  0x28   : > { %v3533_v48 = vpack.i.bf16 %v605_v45, %v606_v46  ;;  %v424_v49 = vrot.slane %v4041_v41, 1  ;;  %v533_v51 = vrot.slane %v4011_v24, 2  ;;  %v534_v53 = vrot.slane %v4032_v38, 2 }
  0x29   : > { %3529 = vrot.lane.b32.xlu1 %v3528_v44, %s3857_s9  ;;  %v521_v52 = vsel %vm473_vm1, %v422_v34, %v423_v47  ;;  %v535_v54 = vrot.slane %v4041_v41, 2  ;;  %v4058_v55 = vunpack.c.l.bf16 %v3195_v43  ;;  %v632_v59 = vsel %vm582_vm0, %v5511_v42, %v532_v50  ;;  %v3201_v42 = vld [vmem:[%s3968_s7 + $0xb0] sm:$0xff]  }
  0x2a   : > { %3519 = vrot.lane.b32.xlu0 %v3518_v35, %s3857_s9  ;;  %v520_v57 = vsel %vm473_vm1, %v423_v47, %v424_v49  ;;  %v631_v58 = vsel %vm582_vm0, %v532_v50, %v533_v51  ;;  %v4070_v60 = vunpack.c.h.bf16 %v3195_v43  ;;  %v630_v3 = vsel %vm582_vm0, %v533_v51, %v534_v53 }
  0x2b   : > { %v3538_v62 = vpack.i.bf16 %v520_v57, %v521_v52  ;;  %v3543_v63 = vpack.i.bf16 %v631_v58, %v632_v59  ;;  %v629_v0 = vsel %vm582_vm0, %v534_v53, %v535_v54  ;;  %v449_v9 = vrot.slane %v4058_v55, 1  ;;  %v3198_v58 = vld [vmem:[%s3968_s7 + $0x98] sm:$0xff]  }
  0x2c   : > { %v3548_v4 = vpack.i.bf16 %v629_v0, %v630_v3  ;;  %v450_v15 = vrot.slane %v4070_v60, 1  ;;  %v4081_v16 = vunpack.c.l.bf16 %v3196_v56  ;;  %v4084_v18 = vunpack.c.h.bf16 %v3196_v56  ;;  %v3185_v0 = vld [vmem:[%s3968_s7 + $0x30] sm:$0xff]  }
  0x2d   : > { %3539 = vrot.lane.b32.xlu1 %v3538_v62, %s3857_s9  ;;  %v560_v19 = vrot.slane %v4058_v55, 2  ;;  %v561_v20 = vrot.slane %v4070_v60, 2  ;;  %v4088_v22 = vunpack.c.l.bf16 %v3183_v61  ;;  %v495_v26 = vsel %vm473_vm1, %v448_v21, %v449_v9 }
  0x2e   : > { %3534 = vrot.lane.b32.xlu0 %v3533_v48, %s3856_s8  ;;  %v494_v23 = vsel %vm473_vm1, %v449_v9, %v450_v15  ;;  %v451_v27 = vrot.slane %v4081_v16, 1  ;;  %v4098_v28 = vunpack.c.h.bf16 %v3183_v61  ;;  %v452_v31 = vrot.slane %v4084_v18, 1  ;;  %v3197_v48 = vld [vmem:[%s3968_s7 + $0x90] sm:$0xff]  }
  0x2f   : > { %v3553_v30 = vpack.i.bf16 %v494_v23, %v495_v26  ;;  %v603_v32 = vsel %vm582_vm0, %v560_v19, %v561_v20  ;;  %v604_v34 = vsel %vm582_vm0, %v559_v37, %v560_v19  ;;  %v425_v21 = vrot.slane %v4088_v22, 1 }
  0x30   : > { %v493_v33 = vsel %vm473_vm1, %v450_v15, %v451_v27  ;;  %v426_v35 = vrot.slane %v4098_v28, 1  ;;  %v492_v36 = vsel %vm473_vm1, %v451_v27, %v452_v31  ;;  %v562_v39 = vrot.slane %v4081_v16, 2 }
  0x31   : > { %3549 = vrot.lane.b32.xlu1 %v3548_v4, %s3856_s8  ;;  %v563_v40 = vrot.slane %v4084_v18, 2  ;;  %v4117_v43 = vunpack.c.l.bf16 %v3184_v29  ;;  %v3558_v37 = vpack.i.bf16 %v492_v36, %v493_v33  ;;  %v519_v45 = vsel %vm473_vm1, %v424_v49, %v425_v21  ;;  %v3186_v33 = vld [vmem:[%s3968_s7 + $0x38] sm:$0xff]  }
  0x32   : > { %3544 = vrot.lane.b32.xlu0 %v3543_v63, %s3856_s8  ;;  %v518_v44 = vsel %vm473_vm1, %v425_v21, %v426_v35  ;;  %v4124_v46 = vunpack.c.h.bf16 %v3184_v29  ;;  %v3563_v50 = vpack.i.bf16 %v603_v32, %v604_v34  ;;  %v602_v56 = vsel %vm582_vm0, %v561_v20, %v562_v39 }
  0x33   : > { %v427_v47 = vrot.slane %v4117_v43, 1  ;;  %v3568_v51 = vpack.i.bf16 %v518_v44, %v519_v45  ;;  %v601_v53 = vsel %vm582_vm0, %v562_v39, %v563_v40  ;;  %v538_v49 = vrot.slane %v4117_v43, 2 }
  0x34   : > { %v428_v52 = vrot.slane %v4124_v46, 1  ;;  %v539_v57 = vrot.slane %v4124_v46, 2  ;;  %v537_v62 = vrot.slane %v4098_v28, 2  ;;  %v4143_v63 = vunpack.c.h.bf16 %v3197_v48 }
  0x35   : > { %3559 = vrot.lane.b32.xlu1 %v3558_v37, %s3857_s9  ;;  %v517_v61 = vsel %vm473_vm1, %v426_v35, %v427_v47  ;;  %v536_v3 = vrot.slane %v4088_v22, 2  ;;  %v4147_v4 = vunpack.c.l.bf16 %v3197_v48  ;;  %v3573_v9 = vpack.i.bf16 %v601_v53, %v602_v56 }
  0x36   : > { %3554 = vrot.lane.b32.xlu0 %v3553_v30, %s3857_s9  ;;  %v516_v59 = vsel %vm473_vm1, %v427_v47, %v428_v52  ;;  %v4149_v15 = vunpack.c.l.bf16 %v3198_v58  ;;  %v625_v20 = vsel %vm582_vm0, %v538_v49, %v539_v57  ;;  %v4156_v23 = vunpack.c.h.bf16 %v3198_v58 }
  0x37   : > { %v3578_v19 = vpack.i.bf16 %v516_v59, %v517_v61  ;;  %v4158_v26 = vunpack.c.l.bf16 %v3185_v0  ;;  %v626_v27 = vsel %vm582_vm0, %v537_v62, %v538_v49  ;;  %v454_v29 = vrot.slane %v4143_v63, 1 }
  0x38   : > { %v455_v30 = vrot.slane %v4149_v15, 1  ;;  %v4165_v32 = vunpack.c.h.bf16 %v3185_v0  ;;  %v627_v34 = vsel %vm582_vm0, %v536_v3, %v537_v62  ;;  %v628_v21 = vsel %vm582_vm0, %v535_v54, %v536_v3 }
  0x39   : > { %3569 = vrot.lane.b32.xlu1 %v3568_v51, %s3857_s9  ;;  %v453_v35 = vrot.slane %v4147_v4, 1  ;;  %v456_v36 = vrot.slane %v4156_v23, 1  ;;  %v564_v39 = vrot.slane %v4147_v4, 2  ;;  %v565_v37 = vrot.slane %v4143_v63, 2 }
  0x3a   : > { %3564 = vrot.lane.b32.xlu0 %v3563_v50, %s3856_s8  ;;  %v3588_v44 = vpack.i.bf16 %v625_v20, %v626_v27  ;;  %v429_v45 = vrot.slane %v4158_v26, 1  ;;  %v430_v47 = vrot.slane %v4165_v32, 1  ;;  %v4181_v48 = vunpack.c.l.bf16 %v3186_v33  ;;  %v3199_v20 = vld [vmem:[%s3968_s7 + $0xa0] sm:$0xff]   ;;  %v3200_v27 = vld [vmem:[%s3968_s7 + $0xa8] sm:$0xff]  }
  0x3b   : > { %v3583_v54 = vpack.i.bf16 %v627_v34, %v628_v21  ;;  %v488_v50 = vsel %vm473_vm1, %v455_v30, %v456_v36  ;;  %v489_v51 = vsel %vm473_vm1, %v454_v29, %v455_v30  ;;  %v4190_v53 = vunpack.c.h.bf16 %v3186_v33 }
  0x3c   : > { %v490_v56 = vsel %vm473_vm1, %v453_v35, %v454_v29  ;;  %v491_v49 = vsel %vm473_vm1, %v452_v31, %v453_v35  ;;  %v599_v58 = vsel %vm582_vm0, %v564_v39, %v565_v37  ;;  %v600_v59 = vsel %vm582_vm0, %v563_v40, %v564_v39 }
  0x3d   : > { %3579 = vrot.lane.b32.xlu1 %v3578_v19, %s3857_s9  ;;  %5537 = vst [vmem:[#allocation6_spill] sm:$0xff] %v4190_v53  ;;  %v566_v61 = vrot.slane %v4149_v15, 2  ;;  %v567_v62 = vrot.slane %v4156_v23, 2  ;;  %v3598_v0 = vpack.i.bf16 %v488_v50, %v489_v51  ;;  %v514_v3 = vsel %vm473_vm1, %v429_v45, %v430_v47  ;;  %v3187_v50 = vld [vmem:[%s3968_s7 + $0x40] sm:$0xff]  }
  0x3e   : > { %3574 = vrot.lane.b32.xlu0 %v3573_v9, %s3856_s8  ;;  %v515_v9 = vsel %vm473_vm1, %v428_v52, %v429_v45  ;;  %v431_v31 = vrot.slane %v4181_v48, 1  ;;  %v3593_v19 = vpack.i.bf16 %v490_v56, %v491_v49  ;;  %v432_v40 = vrot.slane %v4190_v53, 1 }
  0x3f   : > { %v3603_v29 = vpack.i.bf16 %v599_v58, %v600_v59  ;;  %v3608_v30 = vpack.i.bf16 %v514_v3, %v515_v9  ;;  %v597_v33 = vsel %vm582_vm0, %v566_v61, %v567_v62  ;;  %v598_v34 = vsel %vm582_vm0, %v565_v37, %v566_v61 }
  0x40   : > { %v513_v52 = vsel %vm473_vm1, %v430_v47, %v431_v31  ;;  %v541_v21 = vrot.slane %v4165_v32, 2  ;;  %v542_v35 = vrot.slane %v4181_v48, 2  ;;  %v543_v39 = vrot.slane %v4190_v53, 2 }
  0x41   : > { %3589 = vrot.lane.b32.xlu1 %v3588_v44, %s3856_s8  ;;  %v512_v44 = vsel %vm473_vm1, %v431_v31, %v432_v40  ;;  %v4227_v45 = vunpack.c.h.bf16 %v3199_v20  ;;  %v4231_v37 = vunpack.c.h.bf16 %v3200_v27  ;;  %v540_v47 = vrot.slane %v4158_v26, 2 }
  0x42   : > { %3584 = vrot.lane.b32.xlu0 %v3583_v54, %s3856_s8  ;;  %v4229_v54 = vunpack.c.l.bf16 %v3200_v27  ;;  %v4235_v51 = vunpack.c.l.bf16 %v3199_v20  ;;  %v3613_v56 = vpack.i.bf16 %v597_v33, %v598_v34  ;;  %v3618_v49 = vpack.i.bf16 %v512_v44, %v513_v52 }
  0x43   : > { %v621_v58 = vsel %vm582_vm0, %v542_v35, %v543_v39  ;;  %v4242_v59 = vunpack.c.l.bf16 %v3187_v50  ;;  %v4244_v61 = vunpack.c.h.bf16 %v3187_v50  ;;  %v458_v3 = vrot.slane %v4227_v45, 1 }
  0x44   : > { %v459_v9 = vrot.slane %v4229_v54, 1  ;;  %v5517_v31 = vrot.slane %v4231_v37, 1  ;;  %v623_v20 = vsel %vm582_vm0, %v540_v47, %v541_v21  ;;  %v624_v27 = vsel %vm582_vm0, %v539_v57, %v540_v47 }
  0x45   : > { %3599 = vrot.lane.b32.xlu1 %v3598_v0, %s3857_s9  ;;  %v622_v0 = vsel %vm582_vm0, %v541_v21, %v542_v35  ;;  %v569_v33 = vrot.slane %v4227_v45, 2  ;;  %v433_v52 = vrot.slane %v4242_v59, 1  ;;  %v434_v35 = vrot.slane %v4244_v61, 1 }
  0x46   : > { %3594 = vrot.lane.b32.xlu0 %v3593_v19, %s3857_s9  ;;  %v3188_v19 = vld [vmem:[%s3968_s7 + $0x48] sm:$0xff]   ;;  %v3628_v34 = vpack.i.bf16 %v621_v58, %v622_v0  ;;  %v3623_v21 = vpack.i.bf16 %v623_v20, %v624_v27  ;;  %v484_v57 = vsel %vm473_vm1, %v459_v9, %v5517_v31  ;;  %v485_v50 = vsel %vm473_vm1, %v458_v3, %v459_v9 }
  0x47   : > { %v4265_v44 = vunpack.c.l.bf16 %v3188_v19  ;;  %v4274_v47 = vunpack.c.h.bf16 %v3188_v19  ;;  %v570_v9 = vrot.slane %v4229_v54, 2  ;;  %v5516_v19 = vrot.slane %v4231_v37, 2 }
  0x48   : > { %v3638_v20 = vpack.i.bf16 %v484_v57, %v485_v50  ;;  %v511_v27 = vsel %vm473_vm1, %v432_v40, %v433_v52  ;;  %v545_v57 = vrot.slane %v4244_v61, 2 }
  0x49   : > { %3609 = vrot.lane.b32.xlu1 %v3608_v30, %s3857_s9  ;;  %v568_v30 = vrot.slane %v4235_v51, 2  ;;  %5538 = vst [vmem:[#allocation7_spill] sm:$0xff] %v4274_v47  ;;  %v594_v40 = vsel %vm582_vm0, %v569_v33, %v570_v9  ;;  %v546_v50 = vrot.slane %v4265_v44, 2 }
  0x4a   : > { %3604 = vrot.lane.b32.xlu0 %v3603_v29, %s3856_s8  ;;  %v457_v29 = vrot.slane %v4235_v51, 1 }
  0x4b   : > { %v595_v58 = vsel %vm582_vm0, %v568_v30, %v569_v33  ;;  %v596_v0 = vsel %vm582_vm0, %v567_v62, %v568_v30  ;;  %v436_v62 = vrot.slane %v4274_v47, 1 }
  0x4c   : > { %v3643_v30 = vpack.i.bf16 %v595_v58, %v596_v0  ;;  %v4315_v58 = vunpack.c.h.bf16 %v3201_v42  ;;  %v4317_v0 = vunpack.c.l.bf16 %v3202_v25 }
  0x4d   : > { %3619 = vrot.lane.b32.xlu1 %v3618_v49, %s3857_s9  ;;  %v486_v49 = vsel %vm473_vm1, %v457_v29, %v458_v3  ;;  %v510_v3 = vsel %vm473_vm1, %v433_v52, %v434_v35  ;;  %v544_v52 = vrot.slane %v4242_v59, 2 }
  0x4e   : > { %3614 = vrot.lane.b32.xlu0 %v3613_v56, %s3856_s8  ;;  %v487_v56 = vsel %vm473_vm1, %v456_v36, %v457_v29  ;;  %v435_v36 = vrot.slane %v4265_v44, 1  ;;  %v3648_v14 = vpack.i.bf16 %v510_v3, %v511_v27  ;;  %5539 = vst [vmem:[#allocation8_spill] sm:$0xff] %v4315_v58  ;;  %v573_v53 = vrot.slane %v4315_v58, 2 }
  0x4f   : > { %v3633_v29 = vpack.i.bf16 %v486_v49, %v487_v56  ;;  %v5515_v49 = vrot.slane %v4274_v47, 2  ;;  %v3189_v56 = vld [vmem:[%s3968_s7 + $0x50] sm:$0xff]  }
  0x50   : > { %v508_v33 = vsel %vm473_vm1, %v435_v36, %v436_v62  ;;  %v4323_v3 = vunpack.c.l.bf16 %v3189_v56  ;;  %v4325_v27 = vunpack.c.h.bf16 %v3189_v56 }
  0x51   : > { %3629 = vrot.lane.b32.xlu1 %v3628_v34, %s3856_s8  ;;  %v593_v34 = vsel %vm582_vm0, %v570_v9, %v5516_v19  ;;  %v4319_v9 = vunpack.c.h.bf16 %v3202_v25  ;;  %v620_v25 = vsel %vm582_vm0, %v543_v39, %v544_v52 }
  0x52   : > { %3624 = vrot.lane.b32.xlu0 %v3623_v21, %s3856_s8  ;;  %v509_v21 = vsel %vm473_vm1, %v434_v35, %v435_v36  ;;  %v4321_v35 = vunpack.c.l.bf16 %v3201_v42  ;;  %5541 = vst [vmem:[#allocation10_spill] sm:$0xff] %v4323_v3  ;;  %5542 = vst [vmem:[#allocation11_spill] sm:$0xff] %v4325_v27  ;;  %v619_v36 = vsel %vm582_vm0, %v544_v52, %v545_v57  ;;  %v437_v39 = vrot.slane %v4323_v3, 1 }
  0x53   : > { %v617_v42 = vsel %vm582_vm0, %v546_v50, %v5515_v49  ;;  %v5519_v56 = vrot.slane %v4319_v9, 1  ;;  %v438_v52 = vrot.slane %v4325_v27, 1 }
  0x54   : > { %5540 = vst [vmem:[#allocation9_spill] sm:$0xff] %v4321_v35  ;;  %v572_v31 = vrot.slane %v4321_v35, 2 }
  0x55   : > { %3639 = vrot.lane.b32.xlu1 %v3638_v20, %s3857_s9  ;;  %v3653_v20 = vpack.i.bf16 %v593_v34, %v594_v40  ;;  %v3190_v34 = vld [vmem:[%s3968_s7 + $0x58] sm:$0xff]   ;;  %v462_v40 = vrot.slane %v4315_v58, 1  ;;  %v3169_v58 = vld [vmem:[%s4373_s13] sm:$0xff]  }
  0x56   : > { %3634 = vrot.lane.b32.xlu0 %v3633_v29, %s3857_s9  ;;  %v3658_v29 = vpack.i.bf16 %v508_v33, %v509_v21  ;;  %v463_v21 = vrot.slane %v4317_v0, 1  ;;  %v461_v33 = vrot.slane %v4321_v35, 1  ;;  %v4348_v17 = vunpack.c.l.bf16 %v3190_v34 }
  0x57   : > { %v574_v35 = vrot.slane %v4317_v0, 2 }
  0x58   : > { %v480_v49 = vsel %vm473_vm1, %v463_v21, %v5519_v56  ;;  %v481_v19 = vsel %vm473_vm1, %v462_v40, %v463_v21 }
  0x59   : > { %3649 = vrot.lane.b32.xlu1 %v3648_v14, %s3857_s9  ;;  %v618_v14 = vsel %vm582_vm0, %v545_v57, %v546_v50  ;;  %v4353_v50 = vunpack.c.h.bf16 %v3190_v34  ;;  %v439_v34 = vrot.slane %v4348_v17, 1 }
  0x5a   : > { %3644 = vrot.lane.b32.xlu0 %v3643_v30, %s3856_s8  ;;  %v3663_v30 = vpack.i.bf16 %v619_v36, %v620_v25  ;;  %v3668_v57 = vpack.i.bf16 %v617_v42, %v618_v14  ;;  %v5544_v36 = vrot.slane %v4231_v37, 1  ;;  %v506_v25 = vsel %vm473_vm1, %v437_v39, %v438_v52 }
  0x5b   : > { %5543 = vst [vmem:[#allocation12_spill] sm:$0xff] %v4353_v50  ;;  %v507_v42 = vsel %vm473_vm1, %v436_v62, %v437_v39  ;;  %v3678_v14 = vpack.i.bf16 %v480_v49, %v481_v19  ;;  %v3203_v62 = vld [vmem:[%s4373_s13 + $0x8] sm:$0xff]   ;;  %v548_v49 = vrot.slane %v4323_v3, 2  ;;  %v590_v3 = vsel %vm582_vm0, %v573_v53, %v574_v35 }
  0x5c   : > { %v3688_v39 = vpack.i.bf16 %v506_v25, %v507_v42  ;;  %v4404_v25 = vunpack.c.l.bf16 %v3169_v58  ;;  %v4406_v42 = vunpack.c.h.bf16 %v3169_v58  ;;  %v4411_v19 = vunpack.c.h.bf16 %v3203_v62 }
  0x5d   : > { %3659 = vrot.lane.b32.xlu1 %v3658_v29, %s3857_s9  ;;  %v482_v29 = vsel %vm473_vm1, %v461_v33, %v462_v40  ;;  %v5523_v40 = vrot.slane %v4353_v50, 1 }
  0x5e   : > { %3654 = vrot.lane.b32.xlu0 %v3653_v20, %s3856_s8  ;;  %v483_v20 = vsel %vm473_vm1, %v5544_v36, %v461_v33  ;;  %v591_v33 = vsel %vm582_vm0, %v572_v31, %v573_v53  ;;  %v5545_v36 = vrot.slane %v4231_v37, 2  ;;  %5546 = vst [vmem:[#allocation13_spill] sm:$0xff] %v4406_v42 }
  0x5f   : > { %v3673_v21 = vpack.i.bf16 %v482_v29, %v483_v20  ;;  %v550_v29 = vrot.slane %v4348_v17, 2  ;;  %v5548_v20 = vrot.slane %v4319_v9, 2 }
  0x60   : > { %v592_v56 = vsel %vm582_vm0, %v5545_v36, %v572_v31  ;;  %v504_v31 = vsel %vm473_vm1, %v439_v34, %v5523_v40  ;;  %v4408_v36 = vunpack.c.l.bf16 %v3203_v62  ;;  %v466_v62 = vrot.slane %v4406_v42, 1 }
  0x61   : > { %3669 = vrot.lane.b32.xlu1 %v3668_v57, %s3856_s8  ;;  %v549_v57 = vrot.slane %v4325_v27, 2  ;;  %v5549_v27 = vrot.slane %v4274_v47, 2  ;;  %v576_v47 = vrot.slane %v4404_v25, 2 }
  0x62   : > { %3664 = vrot.lane.b32.xlu0 %v3663_v30, %s3856_s8  ;;  %v505_v30 = vsel %vm473_vm1, %v438_v52, %v439_v34  ;;  %5547 = vst [vmem:[#allocation14_spill] sm:$0xff] %v4408_v36  ;;  %v3683_v52 = vpack.i.bf16 %v591_v33, %v592_v56  ;;  %v3191_v34 = vld [vmem:[%s3968_s7 + $0x60] sm:$0xff]  }
  0x63   : > { %v3698_v40 = vpack.i.bf16 %v504_v31, %v505_v30  ;;  %v615_v58 = vsel %vm582_vm0, %v548_v49, %v549_v57  ;;  %v616_v56 = vsel %vm582_vm0, %v5549_v27, %v548_v49  ;;  %v614_v53 = vsel %vm582_vm0, %v549_v57, %v550_v29 }
  0x64   : > { %v467_v30 = vrot.slane %v4408_v36, 1  ;;  %v5526_v27 = vrot.slane %v4411_v19, 1  ;;  %v4438_v49 = vunpack.c.l.bf16 %v3191_v34  ;;  %v4440_v31 = vunpack.c.h.bf16 %v3191_v34 }
  0x65   : > { %3679 = vrot.lane.b32.xlu1 %v3678_v14, %s3857_s9  ;;  %v589_v14 = vsel %vm582_vm0, %v574_v35, %v5548_v20  ;;  %v465_v35 = vrot.slane %v4404_v25, 1  ;;  %v4446_v57 = vunpack.c.l.bf16 %v3971_v2  ;;  %v5551_v34 = vrot.slane %v4319_v9, 1 }
  0x66   : > { %3674 = vrot.lane.b32.xlu0 %v3673_v21, %s3857_s9  ;;  %v5550_v21 = vrot.slane %v4353_v50, 2  ;;  %v3693_v20 = vpack.i.bf16 %v589_v14, %v590_v3  ;;  %v4453_v3 = vld [vmem:[%s5508_s2] sm:$0x3f]  }
  0x67   : > { %v478_v14 = vsel %vm473_vm1, %v465_v35, %v466_v62  ;;  %v479_v2 = vsel %vm473_vm1, %v5551_v34, %v465_v35  ;;  %v578_v34 = vrot.slane %v4408_v36, 2  ;;  %v5555_v36 = vrot.slane %v3977_v5, 1 }
  0x68   : > { %v613_v33 = vsel %vm582_vm0, %v550_v29, %v5550_v21  ;;  %v3703_v29 = vpack.i.bf16 %v615_v58, %v616_v56  ;;  %v477_v58 = vsel %vm473_vm1, %v466_v62, %v467_v30  ;;  %v4467_v56 = vld [vmem:[%s5508_s2 + $0x10] sm:$0x3f]   ;;  %v3713_v62 = vpack.i.bf16 %v478_v14, %v479_v2 }
  0x69   : > { %3689 = vrot.lane.b32.xlu1 %v3688_v39, %s3857_s9  ;;  %v3773_v39 = vld [vmem:[%s5508_s2 + $0x8] sm:$0x3f]   ;;  %v3708_v21 = vpack.i.bf16 %v613_v33, %v614_v53  ;;  %v441_v33 = vrot.slane %v4438_v49, 1  ;;  %v442_v53 = vrot.slane %v4440_v31, 1  ;;  %v5553_v2 = vrot.slane %v4353_v50, 1 }
  0x6a   : > { %3684 = vrot.lane.b32.xlu0 %v3683_v52, %s3856_s8  ;;  %v577_v52 = vrot.slane %v4406_v42, 2  ;;  %3433 = vmatprep.subr.msk.bf16.mxu1 %vm1310_vm2, %v3773_v39  ;;  %v1312_v35 = vsel %vm1310_vm2, %v3773_v39, 0  ;;  %v5554_v42 = vrot.slane %v4411_v19, 2 }
  0x6b   : > { %3431 = vmatpush3.bf16.msra.mxu1 %v1312_v35  ;;  %3432 = vmatprep.subr.msk.bf16.mxu0 %vm1310_vm2, %v3773_v39  ;;  %v5552_v39 = vrot.slane %v4319_v9, 2 }
  0x6c   : > { %3281 = vmatpush3.bf16.msra.mxu0 %v1312_v35  ;;  %3434 = vmatprep.subr.msk.bf16.mxu1 %vm1310_vm2, %v4453_v3  ;;  %v3073_v35 = vld [vmem:[%s3968_s7] sm:$0xff]   ;;  %s3861_s7 = smov 72  }
  0x6d   : > { %3699 = vrot.lane.b32.xlu1 %v3698_v40, %s3857_s9  ;;  %v476_v40 = vsel %vm473_vm1, %v467_v30, %v5526_v27  ;;  %3435 = vmatprep.subr.msk.bf16.mxu0 %vm1310_vm2, %v4467_v56  ;;  %v588_v14 = vsel %vm582_vm0, %v5552_v39, %v576_v47  ;;  %v552_v39 = vrot.slane %v4438_v49, 2 }
  0x6e   : > { %3694 = vrot.lane.b32.xlu0 %v3693_v20, %s3856_s8  ;;  %v3718_v30 = vpack.i.bf16 %v476_v40, %v477_v58  ;;  %v587_v20 = vsel %vm582_vm0, %v576_v47, %v577_v52  ;;  %v503_v58 = vsel %vm473_vm1, %v5553_v2, %v441_v33  ;;  %v443_v40 = vrot.slane %v4446_v57, 1 }
  0x6f   : > { %v3723_v27 = vpack.i.bf16 %v587_v20, %v588_v14  ;;  %v585_v47 = vsel %vm582_vm0, %v578_v34, %v5554_v42  ;;  %v554_v20 = vrot.slane %v4446_v57, 2  ;;  %v586_v42 = vsel %vm582_vm0, %v577_v52, %v578_v34 }
  0x70   : > { %v501_v2 = vsel %vm473_vm1, %v442_v53, %v443_v40  ;;  %v4519_v14 = vunpack.c.l.bf16 %v3985_v8  ;;  %v5557_v52 = vrot.slane %v3977_v5, 2 }
  0x71   : > { %3709 = vrot.lane.b32.xlu1 %v3708_v21, %s3856_s8  ;;  %v502_v21 = vsel %vm473_vm1, %v441_v33, %v442_v53  ;;  %v500_v33 = vsel %vm473_vm1, %v443_v40, %v5555_v36  ;;  %v3733_v53 = vpack.i.bf16 %v585_v47, %v586_v42 }
  0x72   : > { %3704 = vrot.lane.b32.xlu0 %v3703_v29, %s3856_s8  ;;  %v3728_v29 = vpack.i.bf16 %v502_v21, %v503_v58  ;;  %v4523_v21 = vunpack.c.h.bf16 %v3073_v35  ;;  %v3738_v36 = vpack.i.bf16 %v500_v33, %v501_v2  ;;  %v5556_v58 = vrot.slane %v4353_v50, 2  ;;  %v3204_v33 = vld [vmem:[%s4373_s13 + $0x10] sm:$0xff]   ;;  %s3866_s13 = smov 16  }
  0x73   : > { %v609_v8 = vsel %vm582_vm0, %v554_v20, %v5557_v52  ;;  %v4546_v52 = vunpack.c.l.bf16 %v3204_v33 }
  0x74   : > { %v612_v40 = vsel %vm582_vm0, %v5556_v58, %v552_v39  ;;  %v418_v47 = vrot.slane %v4523_v21, 1  ;;  %v530_v58 = vrot.slane %v4519_v14, 2 }
  0x75   : > { %3719 = vrot.lane.b32.xlu1 %v3718_v30, %s3857_s9  ;;  %v553_v30 = vrot.slane %v4440_v31, 2  ;;  %5558 = vst [vmem:[#allocation15_spill] sm:$0xff] %v4546_v52 }
  0x76   : > { %3714 = vrot.lane.b32.xlu0 %v3713_v62, %s3857_s9  ;;  %v4521_v62 = vunpack.c.l.bf16 %v3073_v35 }
  0x77   : > { %v610_v34 = vsel %vm582_vm0, %v553_v30, %v554_v20  ;;  %v611_v35 = vsel %vm582_vm0, %v552_v39, %v553_v30  ;;  %v4548_v20 = vunpack.c.h.bf16 %v3204_v33 }
  0x78   : > { %v3748_v2 = vpack.i.bf16 %v609_v8, %v610_v34  ;;  %v3743_v42 = vpack.i.bf16 %v611_v35, %v612_v40  ;;  %v528_v50 = vrot.slane %v4521_v62, 2 }
  0x79   : > { %3729 = vrot.lane.b32.xlu1 %v3728_v29, %s3857_s9  ;;  %v419_v29 = vrot.slane %v4519_v14, 1  ;;  %5559 = vst [vmem:[#allocation16_spill] sm:$0xff] %v4548_v20  ;;  %v470_v33 = vrot.slane %v4548_v20, 1 }
  0x7a   : > { %3724 = vrot.lane.b32.xlu0 %v3723_v27, %s3856_s8  ;;  %v417_v27 = vrot.slane %v4521_v62, 1 }
  0x7b   : > { %v525_v39 = vsel %vm473_vm1, %v418_v47, %v419_v29 }
  0x7c   : > { %v526_v30 = vsel %vm473_vm1, %v417_v27, %v418_v47  ;;  %v469_v47 = vrot.slane %v4546_v52, 1 }
  0x7d   : > { %3739 = vrot.lane.b32.xlu1 %v3738_v36, %s3857_s9  ;;  %v529_v36 = vrot.slane %v4523_v21, 2  ;;  %v3753_v8 = vpack.i.bf16 %v525_v39, %v526_v30  ;;  %v5562_v30 = vrot.slane %v4411_v19, 1 }
  0x7e   : > { %3734 = vrot.lane.b32.xlu0 %v3733_v53, %s3856_s8  ;;  %v5560_v53 = vrot.slane %v3993_v12, 1  ;;  %v474_v39 = vsel %vm473_vm1, %v469_v47, %v470_v33 }
  0x7f   : > { %v634_v34 = vsel %vm582_vm0, %v529_v36, %v530_v58  ;;  %v635_v35 = vsel %vm582_vm0, %v528_v50, %v529_v36  ;;  %v475_v36 = vsel %vm473_vm1, %v5562_v30, %v469_v47 }
  0x80   : > { %v524_v40 = vsel %vm473_vm1, %v419_v29, %v5560_v53  ;;  %v580_v53 = vrot.slane %v4546_v52, 2 }
  0x81   : > { %3749 = vrot.lane.b32.xlu1 %v3748_v2, %s3856_s8  ;;  %v5561_v2 = vrot.slane %v3993_v12, 2 }
  0x82   : > { %3744 = vrot.lane.b32.xlu0 %v3743_v42, %s3856_s8  ;;  %v3758_v42 = vpack.i.bf16 %v634_v34, %v635_v35  ;;  %v5563_v35 = vrot.slane %v4411_v19, 2 }
  0x83   : > { %v633_v29 = vsel %vm582_vm0, %v530_v58, %v5561_v2  ;;  %v527_v58 = vsel %vm473_vm1, %v470_v33, %v417_v27  ;;  %vm2846_vm1 = vcmask 850944  }
  0x84   : > { %v584_v47 = vsel %vm582_vm0, %v5563_v35, %v580_v53 }
  0x85   : > { %695 = vrot.lane.b32.xlu1 %v524_v40, %s3857_s9  ;;  %v581_v40 = vrot.slane %v4548_v20, 2 }
  0x86   : > { %3754 = vrot.lane.b32.xlu0 %v3753_v8, %s3857_s9  ;;  %v3763_v8 = vpack.i.bf16 %v474_v39, %v475_v36 }
  0x87   : > { %v583_v34 = vsel %vm582_vm0, %v580_v53, %v581_v40 }
  0x88   : > { %v3768_v2 = vpack.i.bf16 %v583_v34, %v584_v47 }
  0x89   : > { %911 = vrot.lane.b32.xlu1 %v633_v29, %s3856_s8  ;;  %v636_v29 = vsel %vm582_vm0, %v581_v40, %v528_v50  ;;  %vm2843_vm0 = vcmask 785408  }
  0x8a   : > { %3759 = vrot.lane.b32.xlu0 %v3758_v42, %s3856_s8 }
  0x8d   : > { %797 = vrot.lane.b32.xlu1 %v527_v58, %s3857_s9 }
  0x8e   : > { %3764 = vrot.lane.b32.xlu0 %v3763_v8, %s3857_s9  ;;  %s3862_s9 = smov 80  }
  0x91   : > { %1013 = vrot.lane.b32.xlu1 %v636_v29, %s3856_s8 }
  0x92   : > { %3769 = vrot.lane.b32.xlu0 %v3768_v2, %s3856_s8 }
  0x97   : > { %v3525_v27 = vpop.permute.xlu1 %3524 }
  0x98   : > { %v3527_v33 = vunpack.i.h.bf16 %v3525_v27  ;;  %v3526_v42 = vunpack.i.l.bf16 %v3525_v27  ;;  %v3515_v39 = vpop.permute.xlu0 %3514 }
  0x99   : > { %v3517_v30 = vunpack.i.h.bf16 %v3515_v39  ;;  %v3516_v36 = vunpack.i.l.bf16 %v3515_v39 }
  0x9b   : > { %v3530_v53 = vpop.permute.xlu1 %3529  ;;  %v1097_v8 = vsel %vm1069_vm3, %v3977_v5, %v3516_v36  ;;  %v1098_v58 = vsel %vm1069_vm3, %v3979_v6, %v3517_v30  ;;  %v1601_v6 = vsel %vm1310_vm2, %v4453_v3, 0 }
  0x9c   : > { %v3520_v50 = vpop.permute.xlu0 %3519  ;;  %v4603_v40 = vsel %vm1124_vm4, %v1097_v8, %v3526_v42  ;;  %v1153_v34 = vsel %vm1124_vm4, %v1098_v58, %v3527_v33  ;;  %v3532_v30 = vunpack.i.h.bf16 %v3530_v53  ;;  %v3531_v8 = vunpack.i.l.bf16 %v3530_v53 }
  0x9d   : > { %v1217_v35 = vpack.c.bf16 %v1153_v34, %v4603_v40  ;;  %v3522_v47 = vunpack.i.h.bf16 %v3520_v50  ;;  %v3521_v2 = vunpack.i.l.bf16 %v3520_v50 }
  0x9f   : > { %3306 = vmatprep.mubr.msk.bf16.mxu1 %vm1237_vm5, %v1217_v35  ;;  %v3540_v29 = vpop.permute.xlu1 %3539  ;;  %v1100_v42 = vsel %vm1069_vm3, %v3988_v10, %v3522_v47  ;;  %v1099_v33 = vsel %vm1069_vm3, %v3981_v7, %v3521_v2 }
  0xa0   : > { %v3535_v27 = vpop.permute.xlu0 %3534  ;;  %v3542_v39 = vunpack.i.h.bf16 %v3540_v29  ;;  %v3541_v5 = vunpack.i.l.bf16 %v3540_v29 }
  0xa1   : > { %v3537_v36 = vunpack.i.h.bf16 %v3535_v27  ;;  %v3536_v1 = vunpack.i.l.bf16 %v3535_v27 }
  0xa2   : > { %v1076_v35 = vsel %vm1069_vm3, %v4032_v38, %v3542_v39  ;;  %v1075_v29 = vsel %vm1069_vm3, %v4011_v24, %v3541_v5  ;;  %v1074_v24 = vsel %vm1069_vm3, %v3995_v13, %v3532_v30 }
  0xa3   : > { %v1154_v58 = vsel %vm1124_vm4, %v1099_v33, %v3536_v1  ;;  %v1155_v50 = vsel %vm1124_vm4, %v1100_v42, %v3537_v36  ;;  %v3550_v27 = vpop.permute.xlu1 %3549  ;;  %v1073_v1 = vsel %vm1069_vm3, %v3993_v12, %v3531_v8 }
  0xa4   : > { %v4620_v3 = vpack.c.bf16 %v1154_v58, %v1153_v34  ;;  %v1218_v52 = vpack.c.bf16 %v1155_v50, %v1154_v58  ;;  %v3545_v10 = vpop.permute.xlu0 %3544  ;;  %v3552_v47 = vunpack.i.h.bf16 %v3550_v27  ;;  %v3551_v20 = vunpack.i.l.bf16 %v3550_v27 }
  0xa5   : > { %v3547_v7 = vunpack.i.h.bf16 %v3545_v10  ;;  %v3546_v2 = vunpack.i.l.bf16 %v3545_v10 }
  0xa6   : > { %v4623_v53 = vsel %vm1124_vm4, %v1076_v35, %v3552_v47  ;;  %3307 = vmatmul.mubr.msk.bf16.vlgmr.msra.gmra.mrb[0].mxu1 %vm1237_vm5, %v1218_v52  ;;  %v4631_v38 = vsel %vm1124_vm4, %v1075_v29, %v3551_v20  ;;  %v1833_v20 = vsel %vm1310_vm2, %v4467_v56, 0  ;;  %vm2849_vm2 = vcmask 916480  }
  0xa7   : > { %v3560_v34 = vpop.permute.xlu1 %3559  ;;  %v4634_v39 = vsel %vm1124_vm4, %v1073_v1, %v3546_v2  ;;  %v4637_v5 = vsel %vm1124_vm4, %v1074_v24, %v3547_v7  ;;  %v1206_v36 = vpack.c.bf16 %v4623_v53, %v4631_v38  ;;  %3331 = vmatpush3.bf16.msra.mxu1 %v1601_v6 }
  0xa8   : > { %v3555_v52 = vpop.permute.xlu0 %3554  ;;  %v1181_v12 = vpack.c.bf16 %v4631_v38, %v4637_v5  ;;  %v1205_v13 = vpack.c.bf16 %v4637_v5, %v4634_v39  ;;  %v3562_v27 = vunpack.i.h.bf16 %v3560_v34  ;;  %v3561_v10 = vunpack.i.l.bf16 %v3560_v34 }
  0xa9   : > { %v3557_v42 = vunpack.i.h.bf16 %v3555_v52  ;;  %v3556_v33 = vunpack.i.l.bf16 %v3555_v52 }
  0xaa   : > { %3282 = vmatprep.mubr.msk.bf16.mxu0 %vm1237_vm5, %v1205_v13 }
  0xab   : > { %3283 = vmatmul.mubr.msk.bf16.vlgmr.msra.gmra.mrb[0].mxu0 %vm1237_vm5, %v1206_v36  ;;  %v3570_v30 = vpop.permute.xlu1 %3569  ;;  %v1102_v35 = vsel %vm1069_vm3, %v4058_v55, %v3557_v42  ;;  %v1101_v29 = vsel %vm1069_vm3, %v3990_v11, %v3556_v33  ;;  %v1104_v55 = vsel %vm1069_vm3, %v4081_v16, %v3562_v27  ;;  %v1103_v11 = vsel %vm1069_vm3, %v4070_v60, %v3561_v10 }
  0xac   : > { %v3565_v8 = vpop.permute.xlu0 %3564  ;;  %3381 = vmatpush3.bf16.msra.mxu0 %v1833_v20  ;;  %v3572_v34 = vunpack.i.h.bf16 %v3570_v30  ;;  %v3571_v42 = vunpack.i.l.bf16 %v3570_v30 }
  0xad   : > { %v3567_v6 = vunpack.i.h.bf16 %v3565_v8  ;;  %v3566_v58 = vunpack.i.l.bf16 %v3565_v8 }
  0xaf   : > { %v1156_v56 = vsel %vm1124_vm4, %v1101_v29, %v3566_v58  ;;  %v1157_v47 = vsel %vm1124_vm4, %v1102_v35, %v3567_v6  ;;  %v3580_v7 = vpop.permute.xlu1 %3579 }
  0xb0   : > { %v4655_v2 = vpack.c.bf16 %v1156_v56, %v1155_v50  ;;  %v1219_v1 = vpack.c.bf16 %v1157_v47, %v1156_v56  ;;  %v3575_v24 = vpop.permute.xlu0 %3574  ;;  %v3582_v36 = vunpack.i.h.bf16 %v3580_v7  ;;  %v3581_v52 = vunpack.i.l.bf16 %v3580_v7 }
  0xb1   : > { %v3577_v13 = vunpack.i.h.bf16 %v3575_v24  ;;  %v3576_v20 = vunpack.i.l.bf16 %v3575_v24  ;;  %v1078_v56 = vsel %vm1069_vm3, %v4088_v22, %v3572_v34  ;;  %v1077_v7 = vsel %vm1069_vm3, %v4041_v41, %v3571_v42 }
  0xb2   : > { %3310 = vmatprep.mubr.msk.bf16.mxu1 %vm1237_vm5, %v1219_v1  ;;  %v1080_v8 = vsel %vm1069_vm3, %v4117_v43, %v3582_v36  ;;  %v1079_v6 = vsel %vm1069_vm3, %v4098_v28, %v3581_v52 }
  0xb3   : > { %v1158_v33 = vsel %vm1124_vm4, %v1103_v11, %v3576_v20  ;;  %v1159_v50 = vsel %vm1124_vm4, %v1104_v55, %v3577_v13  ;;  %v3590_v58 = vpop.permute.xlu1 %3589 }
  0xb4   : > { %v4668_v35 = vpack.c.bf16 %v1158_v33, %v1157_v47  ;;  %v1220_v16 = vpack.c.bf16 %v1159_v50, %v1158_v33  ;;  %v3585_v29 = vpop.permute.xlu0 %3584  ;;  %v3592_v60 = vunpack.i.h.bf16 %v3590_v58  ;;  %v3591_v27 = vunpack.i.l.bf16 %v3590_v58 }
  0xb5   : > { %v3587_v30 = vunpack.i.h.bf16 %v3585_v29  ;;  %v3586_v10 = vunpack.i.l.bf16 %v3585_v29 }
  0xb6   : > { %v1134_v43 = vsel %vm1124_vm4, %v1079_v6, %v3591_v27  ;;  %v4676_v1 = vsel %vm1124_vm4, %v1080_v8, %v3592_v60  ;;  %3311 = vmatmul.mubr.msk.bf16.gmra.mrb[4].mxu1 %vm1237_vm5, %v1220_v16 }
  0xb7   : > { %v1132_v28 = vsel %vm1124_vm4, %v1077_v7, %v3586_v10  ;;  %v1133_v47 = vsel %vm1124_vm4, %v1078_v56, %v3587_v30  ;;  %v1208_v24 = vpack.c.bf16 %v4676_v1, %v1134_v43  ;;  %v3600_v36 = vpop.permute.xlu1 %3599 }
  0xb8   : > { %v4683_v52 = vpack.c.bf16 %v1132_v28, %v4623_v53  ;;  %v1207_v22 = vpack.c.bf16 %v1133_v47, %v1132_v28  ;;  %v4685_v13 = vpack.c.bf16 %v1134_v43, %v1133_v47  ;;  %v3595_v41 = vpop.permute.xlu0 %3594  ;;  %v3602_v6 = vunpack.i.h.bf16 %v3600_v36 }
  0xb9   : > { %v3597_v20 = vunpack.i.h.bf16 %v3595_v41  ;;  %v3596_v55 = vunpack.i.l.bf16 %v3595_v41  ;;  %v3601_v58 = vunpack.i.l.bf16 %v3600_v36 }
  0xba   : > { %3286 = vmatprep.mubr.msk.bf16.mxu0 %vm1237_vm5, %v1207_v22 }
  0xbb   : > { %3287 = vmatmul.mubr.msk.bf16.gmra.mrb[4].mxu0 %vm1237_vm5, %v1208_v24  ;;  %v3610_v11 = vpop.permute.xlu1 %3609  ;;  %v1106_v8 = vsel %vm1069_vm3, %v4147_v4, %v3597_v20  ;;  %v1105_v53 = vsel %vm1069_vm3, %v4084_v18, %v3596_v55  ;;  %v1108_v4 = vsel %vm1069_vm3, %v4149_v15, %v3602_v6  ;;  %v1107_v18 = vsel %vm1069_vm3, %v4143_v63, %v3601_v58 }
  0xbc   : > { %v3605_v34 = vpop.permute.xlu0 %3604  ;;  %v3612_v47 = vunpack.i.h.bf16 %v3610_v11  ;;  %v3611_v24 = vunpack.i.l.bf16 %v3610_v11 }
  0xbd   : > { %v3607_v42 = vunpack.i.h.bf16 %v3605_v34  ;;  %v3606_v33 = vunpack.i.l.bf16 %v3605_v34 }
  0xbf   : > { %v1160_v16 = vsel %vm1124_vm4, %v1105_v53, %v3606_v33  ;;  %v1161_v29 = vsel %vm1124_vm4, %v1106_v8, %v3607_v42  ;;  %v3620_v60 = vpop.permute.xlu1 %3619  ;;  %v1082_v8 = vsel %vm1069_vm3, %v4158_v26, %v3612_v47  ;;  %v1081_v53 = vsel %vm1069_vm3, %v4124_v46, %v3611_v24 }
  0xc0   : > { %v4695_v27 = vpack.c.bf16 %v1160_v16, %v1159_v50  ;;  %v1221_v30 = vpack.c.bf16 %v1161_v29, %v1160_v16  ;;  %v3615_v10 = vpop.permute.xlu0 %3614  ;;  %v3622_v56 = vunpack.i.h.bf16 %v3620_v60  ;;  %v3621_v7 = vunpack.i.l.bf16 %v3620_v60 }
  0xc1   : > { %v3617_v43 = vunpack.i.h.bf16 %v3615_v10  ;;  %v3616_v28 = vunpack.i.l.bf16 %v3615_v10 }
  0xc2   : > { %3314 = vmatprep.mubr.msk.bf16.mxu1 %vm1237_vm5, %v1221_v30  ;;  %v1084_v22 = vsel %vm1069_vm3, %v4181_v48, %v3622_v56  ;;  %v1083_v41 = vsel %vm1069_vm3, %v4165_v32, %v3621_v7 }
  0xc3   : > { %v1162_v36 = vsel %vm1124_vm4, %v1107_v18, %v3616_v28  ;;  %v1163_v50 = vsel %vm1124_vm4, %v1108_v4, %v3617_v43  ;;  %v3630_v20 = vpop.permute.xlu1 %3629 }
  0xc4   : > { %v4708_v55 = vpack.c.bf16 %v1162_v36, %v1161_v29  ;;  %v1222_v15 = vpack.c.bf16 %v1163_v50, %v1162_v36  ;;  %v3625_v34 = vpop.permute.xlu0 %3624  ;;  %v3632_v63 = vunpack.i.h.bf16 %v3630_v20  ;;  %v3631_v42 = vunpack.i.l.bf16 %v3630_v20 }
  0xc5   : > { %v3627_v11 = vunpack.i.h.bf16 %v3625_v34  ;;  %v3626_v33 = vunpack.i.l.bf16 %v3625_v34 }
  0xc6   : > { %v1138_v48 = vsel %vm1124_vm4, %v1083_v41, %v3631_v42  ;;  %v4716_v6 = vsel %vm1124_vm4, %v1084_v22, %v3632_v63  ;;  %3315 = vmatmul.mubr.msk.bf16.gmra.mrb[8].mxu1 %vm1237_vm5, %v1222_v15 }
  0xc7   : > { %v4720_v32 = vsel %vm1124_vm4, %v1081_v53, %v3626_v33  ;;  %v1137_v58 = vsel %vm1124_vm4, %v1082_v8, %v3627_v11  ;;  %v1210_v16 = vpack.c.bf16 %v4716_v6, %v1138_v48  ;;  %v3640_v29 = vpop.permute.xlu1 %3639 }
  0xc8   : > { %v1209_v26 = vpack.c.bf16 %v1137_v58, %v4720_v32  ;;  %v4725_v60 = vpack.c.bf16 %v1138_v48, %v1137_v58  ;;  %v3635_v46 = vpop.permute.xlu0 %3634  ;;  %v3642_v47 = vunpack.i.h.bf16 %v3640_v29  ;;  %v3641_v24 = vunpack.i.l.bf16 %v3640_v29 }
  0xc9   : > { %v3637_v30 = vunpack.i.h.bf16 %v3635_v46  ;;  %v3636_v10 = vunpack.i.l.bf16 %v3635_v46 }
  0xca   : > { %3290 = vmatprep.mubr.msk.bf16.mxu0 %vm1237_vm5, %v1209_v26 }
  0xcb   : > { %3291 = vmatmul.mubr.msk.bf16.gmra.mrb[8].mxu0 %vm1237_vm5, %v1210_v16  ;;  %v3650_v56 = vpop.permute.xlu1 %3649  ;;  %v1110_v4 = vsel %vm1069_vm3, %v4235_v51, %v3637_v30  ;;  %v1109_v18 = vsel %vm1069_vm3, %v4156_v23, %v3636_v10  ;;  %v1112_v51 = vsel %vm1069_vm3, %v4229_v54, %v3642_v47  ;;  %v1111_v23 = vsel %vm1069_vm3, %v4227_v45, %v3641_v24 }
  0xcc   : > { %v3645_v7 = vpop.permute.xlu0 %3644  ;;  %v3652_v8 = vunpack.i.h.bf16 %v3650_v56  ;;  %v3651_v53 = vunpack.i.l.bf16 %v3650_v56 }
  0xcd   : > { %v3647_v43 = vunpack.i.h.bf16 %v3645_v7  ;;  %v3646_v28 = vunpack.i.l.bf16 %v3645_v7 }
  0xce   : > { %v1086_v7 = vsel %vm1069_vm3, %v4242_v59, %v3652_v8 }
  0xcf   : > { %v1164_v36 = vsel %vm1124_vm4, %v1109_v18, %v3646_v28  ;;  %v1165_v22 = vsel %vm1124_vm4, %v1110_v4, %v3647_v43  ;;  %v3660_v41 = vpop.permute.xlu1 %3659  ;;  %v5564_v43 = vld [vmem:[#allocation6_spill] sm:$0xff] }
  0xd0   : > { %v4735_v20 = vpack.c.bf16 %v1164_v36, %v1163_v50  ;;  %v1223_v15 = vpack.c.bf16 %v1165_v22, %v1164_v36  ;;  %v3655_v34 = vpop.permute.xlu0 %3654  ;;  %v3662_v63 = vunpack.i.h.bf16 %v3660_v41  ;;  %v3661_v42 = vunpack.i.l.bf16 %v3660_v41 }
  0xd1   : > { %v3657_v11 = vunpack.i.h.bf16 %v3655_v34  ;;  %v3656_v33 = vunpack.i.l.bf16 %v3655_v34  ;;  %v1085_v28 = vsel %vm1069_vm3, %v5564_v43, %v3651_v53 }
  0xd2   : > { %3318 = vmatprep.mubr.msk.bf16.mxu1 %vm1237_vm5, %v1223_v15  ;;  %v1088_v58 = vsel %vm1069_vm3, %v4265_v44, %v3662_v63  ;;  %v1087_v16 = vsel %vm1069_vm3, %v4244_v61, %v3661_v42 }
  0xd3   : > { %v1166_v48 = vsel %vm1124_vm4, %v1111_v23, %v3656_v33  ;;  %v1167_v50 = vsel %vm1124_vm4, %v1112_v51, %v3657_v11  ;;  %v3670_v29 = vpop.permute.xlu1 %3669  ;;  %v5565_v11 = vld [vmem:[#allocation9_spill] sm:$0xff] }
  0xd4   : > { %v4748_v26 = vpack.c.bf16 %v1166_v48, %v1165_v22  ;;  %v1224_v54 = vpack.c.bf16 %v1167_v50, %v1166_v48  ;;  %v3665_v46 = vpop.permute.xlu0 %3664  ;;  %v3672_v45 = vunpack.i.h.bf16 %v3670_v29  ;;  %v3671_v30 = vunpack.i.l.bf16 %v3670_v29 }
  0xd5   : > { %v3667_v10 = vunpack.i.h.bf16 %v3665_v46  ;;  %v3666_v56 = vunpack.i.l.bf16 %v3665_v46 }
  0xd6   : > { %v4755_v44 = vsel %vm1124_vm4, %v1087_v16, %v3671_v30  ;;  %v4758_v61 = vsel %vm1124_vm4, %v1088_v58, %v3672_v45  ;;  %3319 = vmatmul.mubr.msk.bf16.gmra.mrb[12].mxu1 %vm1237_vm5, %v1224_v54 }
  0xd7   : > { %v4762_v4 = vsel %vm1124_vm4, %v1085_v28, %v3666_v56  ;;  %v4765_v18 = vsel %vm1124_vm4, %v1086_v7, %v3667_v10  ;;  %v1212_v59 = vpack.c.bf16 %v4758_v61, %v4755_v44  ;;  %v3680_v47 = vpop.permute.xlu1 %3679  ;;  %v5566_v7 = vld [vmem:[#allocation8_spill] sm:$0xff] }
  0xd8   : > { %v1211_v24 = vpack.c.bf16 %v4765_v18, %v4762_v4  ;;  %v3675_v36 = vpop.permute.xlu0 %3674  ;;  %v3682_v23 = vunpack.i.h.bf16 %v3680_v47  ;;  %v3681_v8 = vunpack.i.l.bf16 %v3680_v47 }
  0xd9   : > { %v3677_v22 = vunpack.i.h.bf16 %v3675_v36  ;;  %v3676_v41 = vunpack.i.l.bf16 %v3675_v36 }
  0xda   : > { %3294 = vmatprep.mubr.msk.bf16.mxu0 %vm1237_vm5, %v1211_v24  ;;  %v1116_v56 = vsel %vm1069_vm3, %v4317_v0, %v3682_v23  ;;  %v5567_v24 = vld [vmem:[#allocation11_spill] sm:$0xff] }
  0xdb   : > { %3295 = vmatmul.mubr.msk.bf16.gmra.mrb[12].mxu0 %vm1237_vm5, %v1212_v59  ;;  %v3690_v15 = vpop.permute.xlu1 %3689  ;;  %v1114_v33 = vsel %vm1069_vm3, %v5565_v11, %v3677_v22  ;;  %v1113_v51 = vsel %vm1069_vm3, %v4231_v37, %v3676_v41  ;;  %v1115_v37 = vsel %vm1069_vm3, %v5566_v7, %v3681_v8  ;;  %v5569_v23 = vld [vmem:[#allocation7_spill] sm:$0xff] }
  0xdc   : > { %v3685_v34 = vpop.permute.xlu0 %3684  ;;  %v3692_v43 = vunpack.i.h.bf16 %v3690_v15  ;;  %v3691_v28 = vunpack.i.l.bf16 %v3690_v15 }
  0xdd   : > { %v3687_v63 = vunpack.i.h.bf16 %v3685_v34  ;;  %v3686_v42 = vunpack.i.l.bf16 %v3685_v34 }
  0xde   : > { %v1089_v8 = vsel %vm1069_vm3, %v5569_v23, %v3691_v28  ;;  %v5571_v23 = vld [vmem:[#allocation13_spill] sm:$0xff] }
  0xdf   : > { %v1168_v53 = vsel %vm1124_vm4, %v1113_v51, %v3686_v42  ;;  %v1169_v48 = vsel %vm1124_vm4, %v1114_v33, %v3687_v63  ;;  %v3700_v58 = vpop.permute.xlu1 %3699  ;;  %v5568_v33 = vld [vmem:[#allocation10_spill] sm:$0xff] }
  0xe0   : > { %v4779_v16 = vpack.c.bf16 %v1168_v53, %v1167_v50  ;;  %v1225_v29 = vpack.c.bf16 %v1169_v48, %v1168_v53  ;;  %v3695_v54 = vpop.permute.xlu0 %3694  ;;  %v3702_v46 = vunpack.i.h.bf16 %v3700_v58  ;;  %v3701_v45 = vunpack.i.l.bf16 %v3700_v58 }
  0xe1   : > { %v3697_v30 = vunpack.i.h.bf16 %v3695_v54  ;;  %v3696_v10 = vunpack.i.l.bf16 %v3695_v54  ;;  %v1090_v51 = vsel %vm1069_vm3, %v5568_v33, %v3692_v43 }
  0xe2   : > { %3322 = vmatprep.mubr.msk.bf16.mxu1 %vm1237_vm5, %v1225_v29  ;;  %v1092_v47 = vsel %vm1069_vm3, %v4348_v17, %v3702_v46  ;;  %v1091_v36 = vsel %vm1069_vm3, %v5567_v24, %v3701_v45 }
  0xe3   : > { %v1170_v59 = vsel %vm1124_vm4, %v1115_v37, %v3696_v10  ;;  %v1171_v50 = vsel %vm1124_vm4, %v1116_v56, %v3697_v30  ;;  %v3710_v22 = vpop.permute.xlu1 %3709 }
  0xe4   : > { %v4792_v41 = vpack.c.bf16 %v1170_v59, %v1169_v48  ;;  %v1226_v0 = vpack.c.bf16 %v1171_v50, %v1170_v59  ;;  %v3705_v34 = vpop.permute.xlu0 %3704  ;;  %v3712_v63 = vunpack.i.h.bf16 %v3710_v22  ;;  %v3711_v42 = vunpack.i.l.bf16 %v3710_v22 }
  0xe5   : > { %v3707_v15 = vunpack.i.h.bf16 %v3705_v34  ;;  %v3706_v11 = vunpack.i.l.bf16 %v3705_v34 }
  0xe6   : > { %v4799_v17 = vsel %vm1124_vm4, %v1091_v36, %v3711_v42  ;;  %v4802_v53 = vsel %vm1124_vm4, %v1092_v47, %v3712_v63  ;;  %3323 = vmatmul.mubr.msk.bf16.gmra.mrb[16].mxu1 %vm1237_vm5, %v1226_v0 }
  0xe7   : > { %v4806_v48 = vsel %vm1124_vm4, %v1089_v8, %v3706_v11  ;;  %v4809_v58 = vsel %vm1124_vm4, %v1090_v51, %v3707_v15  ;;  %v1214_v29 = vpack.c.bf16 %v4802_v53, %v4799_v17  ;;  %v3720_v54 = vpop.permute.xlu1 %3719  ;;  %v5570_v51 = vld [vmem:[#allocation14_spill] sm:$0xff] }
  0xe8   : > { %v1213_v46 = vpack.c.bf16 %v4809_v58, %v4806_v48  ;;  %v3715_v45 = vpop.permute.xlu0 %3714  ;;  %v3722_v47 = vunpack.i.h.bf16 %v3720_v54  ;;  %v3721_v24 = vunpack.i.l.bf16 %v3720_v54  ;;  %v1188_v38 = vpack.c.bf16 %v4806_v48, %v4758_v61 }
  0xe9   : > { %v3717_v30 = vunpack.i.h.bf16 %v3715_v45  ;;  %v3716_v10 = vunpack.i.l.bf16 %v3715_v45 }
  0xea   : > { %3298 = vmatprep.mubr.msk.bf16.mxu0 %vm1237_vm5, %v1213_v46  ;;  %v1119_v8 = vsel %vm1069_vm3, %v5571_v23, %v3721_v24 }
  0xeb   : > { %3299 = vmatmul.mubr.msk.bf16.gmra.mrb[16].mxu0 %vm1237_vm5, %v1214_v29  ;;  %v3730_v56 = vpop.permute.xlu1 %3729  ;;  %v1118_v28 = vsel %vm1069_vm3, %v4404_v25, %v3717_v30  ;;  %v1117_v59 = vsel %vm1069_vm3, %v4319_v9, %v3716_v10  ;;  %v1120_v9 = vsel %vm1069_vm3, %v5570_v51, %v3722_v47 }
  0xec   : > { %v3725_v7 = vpop.permute.xlu0 %3724  ;;  %v3732_v29 = vunpack.i.h.bf16 %v3730_v56  ;;  %v3731_v54 = vunpack.i.l.bf16 %v3730_v56 }
  0xed   : > { %v3727_v37 = vunpack.i.h.bf16 %v3725_v7  ;;  %v3726_v43 = vunpack.i.l.bf16 %v3725_v7 }
  0xee   : > { %v1094_v24 = vsel %vm1069_vm3, %v4438_v49, %v3732_v29 }
  0xef   : > { %v1172_v36 = vsel %vm1124_vm4, %v1117_v59, %v3726_v43  ;;  %v4823_v22 = vsel %vm1124_vm4, %v1118_v28, %v3727_v37  ;;  %v3740_v0 = vpop.permute.xlu1 %3739 }
  0xf0   : > { %v4825_v34 = vpack.c.bf16 %v1172_v36, %v1171_v50  ;;  %v1227_v63 = vpack.c.bf16 %v4823_v22, %v1172_v36  ;;  %v3735_v42 = vpop.permute.xlu0 %3734  ;;  %v3742_v15 = vunpack.i.h.bf16 %v3740_v0  ;;  %v3741_v11 = vunpack.i.l.bf16 %v3740_v0  ;;  %v5572_v36 = vld [vmem:[#allocation12_spill] sm:$0xff] }
  0xf1   : > { %v3737_v33 = vunpack.i.h.bf16 %v3735_v42  ;;  %v3736_v25 = vunpack.i.l.bf16 %v3735_v42 }
  0xf2   : > { %3326 = vmatprep.mubr.msk.bf16.mxu1 %vm1237_vm5, %v1227_v63  ;;  %v1096_v45 = vsel %vm1069_vm3, %v4446_v57, %v3742_v15  ;;  %v1095_v30 = vsel %vm1069_vm3, %v4440_v31, %v3741_v11  ;;  %v1093_v57 = vsel %vm1069_vm3, %v5572_v36, %v3731_v54 }
  0xf3   : > { %v4834_v50 = vsel %vm1124_vm4, %v1119_v8, %v3736_v25  ;;  %v4837_v46 = vsel %vm1124_vm4, %v1120_v9, %v3737_v33  ;;  %v3750_v10 = vpop.permute.xlu1 %3749 }
  0xf4   : > { %v1228_v7 = vpack.c.bf16 %v4837_v46, %v4834_v50  ;;  %v1812_v56 = vpack.c.bf16 %v4834_v50, %v4823_v22  ;;  %v3745_v37 = vpop.permute.xlu0 %3744  ;;  %v3752_v43 = vunpack.i.h.bf16 %v3750_v10  ;;  %v3751_v28 = vunpack.i.l.bf16 %v3750_v10 }
  0xf5   : > { %v3747_v59 = vunpack.i.h.bf16 %v3745_v37  ;;  %v3746_v47 = vunpack.i.l.bf16 %v3745_v37 }
  0xf6   : > { %v1150_v31 = vsel %vm1124_vm4, %v1095_v30, %v3751_v28  ;;  %v1151_v0 = vsel %vm1124_vm4, %v1096_v45, %v3752_v43  ;;  %3327 = vmatmul.mubr.msk.bf16.gmra.mrb[20].mxu1 %vm1237_vm5, %v1228_v7  ;;  %v1184_v28 = vpack.c.bf16 %v4720_v32, %v4676_v1 }
  0xf7   : > { %v1148_v63 = vsel %vm1124_vm4, %v1093_v57, %v3746_v47  ;;  %v1149_v42 = vsel %vm1124_vm4, %v1094_v24, %v3747_v59  ;;  %v1216_v15 = vpack.c.bf16 %v1151_v0, %v1150_v31  ;;  %v696_v11 = vpop.permute.xlu1 %695  ;;  %v1192_v1 = vpack.c.bf16 %v4603_v40, %v1151_v0 }
  0xf8   : > { %v1215_v33 = vpack.c.bf16 %v1149_v42, %v1148_v63  ;;  %v3755_v25 = vpop.permute.xlu0 %3754  ;;  %v1072_v49 = vsel %vm1069_vm3, %v4519_v14, %v696_v11  ;;  %v1190_v5 = vpack.c.bf16 %v1148_v63, %v4802_v53 }
  0xf9   : > { %v3757_v51 = vunpack.i.h.bf16 %v3755_v25  ;;  %v3756_v9 = vunpack.i.l.bf16 %v3755_v25 }
  0xfa   : > { %3302 = vmatprep.mubr.msk.bf16.mxu0 %vm1237_vm5, %v1215_v33 }
  0xfb   : > { %3303 = vmatmul.mubr.msk.bf16.gmra.mrb[20].mxu0 %vm1237_vm5, %v1216_v15  ;;  %v912_v23 = vpop.permute.xlu1 %911  ;;  %v1071_v45 = vsel %vm1069_vm3, %v4523_v21, %v3757_v51  ;;  %v1070_v30 = vsel %vm1069_vm3, %v4521_v62, %v3756_v9  ;;  %v1186_v62 = vpack.c.bf16 %v4762_v4, %v4716_v6  ;;  %v1187_v21 = vpack.c.bf16 %v4755_v44, %v4765_v18 }
  0xfc   : > { %3382 = vmatprep.mubr.msk.bf16.mxu0 %vm1237_vm5, %v4683_v52  ;;  %v3760_v8 = vpop.permute.xlu0 %3759  ;;  %v1127_v10 = vsel %vm1124_vm4, %v1072_v49, %v912_v23 }
  0xfd   : > { %v3762_v29 = vunpack.i.h.bf16 %v3760_v8  ;;  %v3761_v54 = vunpack.i.l.bf16 %v3760_v8  ;;  %v1180_v43 = vpack.c.bf16 %v4634_v39, %v1127_v10  ;;  %v1189_v39 = vpack.c.bf16 %v4799_v17, %v4809_v58 }
  0xff   : > { %v1125_v7 = vsel %vm1124_vm4, %v1070_v30, %v3761_v54  ;;  %v1126_v14 = vsel %vm1124_vm4, %v1071_v45, %v3762_v29 }
 0x100   : > { %v1179_v37 = vpack.c.bf16 %v1126_v14, %v1125_v7  ;;  %v3765_v40 = vpop.permute.xlu0 %3764 }
 0x102   : > { %3332 = vmatprep.mubr.msk.bf16.mxu1 %vm1237_vm5, %v1179_v37 }
 0x103   : > { %3333 = vmatmul.mubr.msk.bf16.vlgmr.msra.gmra.mrb[24].mxu1 %vm1237_vm5, %v1180_v43  ;;  %3383 = vmatmul.mubr.msk.bf16.vlgmr.msra.gmra.mrb[24].mxu0 %vm1237_vm5, %v4685_v13 }
 0x104   : > { %3386 = vmatprep.mubr.msk.bf16.mxu0 %vm1237_vm5, %v1184_v28  ;;  %3336 = vmatprep.mubr.msk.bf16.mxu1 %vm1237_vm5, %v1181_v12  ;;  %v1191_v12 = vpack.c.bf16 %v1150_v31, %v1149_v42 }
 0x10b   : > { %3337 = vmatmul.mubr.msk.bf16.gmra.mrb[28].mxu1 %vm1237_vm5, %v4683_v52  ;;  %3387 = vmatmul.mubr.msk.bf16.gmra.mrb[28].mxu0 %vm1237_vm5, %v4725_v60 }
 0x10c   : > { %3340 = vmatprep.mubr.msk.bf16.mxu1 %vm1237_vm5, %v4685_v13  ;;  %3390 = vmatprep.mubr.msk.bf16.mxu0 %vm1237_vm5, %v1186_v62  ;;  %v798_v13 = vpop.permute.xlu1 %797 }
 0x113   : > { %3341 = vmatmul.mubr.msk.bf16.gmra.mrb[32].mxu1 %vm1237_vm5, %v1184_v28  ;;  %3391 = vmatmul.mubr.msk.bf16.gmra.mrb[32].mxu0 %vm1237_vm5, %v1187_v21 }
 0x114   : > { %3344 = vmatprep.mubr.msk.bf16.mxu1 %vm1237_vm5, %v4725_v60  ;;  %3394 = vmatprep.mubr.msk.bf16.mxu0 %vm1237_vm5, %v1188_v38  ;;  %v5573_v60 = vld [vmem:[#allocation16_spill] sm:$0xff] }
 0x11b   : > { %3345 = vmatmul.mubr.msk.bf16.gmra.mrb[36].mxu1 %vm1237_vm5, %v1186_v62  ;;  %3395 = vmatmul.mubr.msk.bf16.gmra.mrb[36].mxu0 %vm1237_vm5, %v1189_v39 }
 0x11c   : > { %3348 = vmatprep.mubr.msk.bf16.mxu1 %vm1237_vm5, %v1187_v21  ;;  %3398 = vmatprep.mubr.msk.bf16.mxu0 %vm1237_vm5, %v1190_v5 }
 0x123   : > { %3349 = vmatmul.mubr.msk.bf16.gmra.mrb[40].mxu1 %vm1237_vm5, %v1188_v38  ;;  %3399 = vmatmul.mubr.msk.bf16.gmra.mrb[40].mxu0 %vm1237_vm5, %v1191_v12 }
 0x124   : > { %3352 = vmatprep.mubr.msk.bf16.mxu1 %vm1237_vm5, %v1189_v39  ;;  %3402 = vmatprep.mubr.msk.bf16.mxu0 %vm1237_vm5, %v1192_v1 }
 0x12b   : > { %3353 = vmatmul.mubr.msk.bf16.gmra.mrb[44].mxu1 %vm1237_vm5, %v1190_v5  ;;  %3403 = vmatmul.mubr.msk.bf16.gmra.mrb[44].mxu0 %vm1237_vm5, %v4620_v3 }
 0x12c   : > { %3356 = vmatprep.mubr.msk.bf16.mxu1 %vm1237_vm5, %v1191_v12  ;;  %3406 = vmatprep.mubr.msk.bf16.mxu0 %vm1237_vm5, %v4655_v2 }
 0x133   : > { %3357 = vmatmul.mubr.msk.bf16.gmra.mrb[48].mxu1 %vm1237_vm5, %v1192_v1  ;;  %3407 = vmatmul.mubr.msk.bf16.gmra.mrb[48].mxu0 %vm1237_vm5, %v4668_v35 }
 0x134   : > { %3360 = vmatprep.mubr.msk.bf16.mxu1 %vm1237_vm5, %v4620_v3  ;;  %3410 = vmatprep.mubr.msk.bf16.mxu0 %vm1237_vm5, %v4695_v27  ;;  %v3766_v3 = vunpack.i.l.bf16 %v3765_v40 }
 0x13b   : > { %3361 = vmatmul.mubr.msk.bf16.gmra.mrb[52].mxu1 %vm1237_vm5, %v4655_v2  ;;  %3411 = vmatmul.mubr.msk.bf16.gmra.mrb[52].mxu0 %vm1237_vm5, %v4708_v55  ;;  %v3770_v2 = vpop.permute.xlu0 %3769 }
 0x13c   : > { %3364 = vmatprep.mubr.msk.bf16.mxu1 %vm1237_vm5, %v4668_v35  ;;  %3414 = vmatprep.mubr.msk.bf16.mxu0 %vm1237_vm5, %v4735_v20  ;;  %v3771_v52 = vunpack.i.l.bf16 %v3770_v2  ;;  %v1121_v35 = vsel %vm1069_vm3, %v4411_v19, %v3766_v3  ;;  %v3772_v6 = vunpack.i.h.bf16 %v3770_v2  ;;  %v1014_v19 = vpop.permute.xlu1 %1013 }
 0x143   : > { %3365 = vmatmul.mubr.msk.bf16.gmra.mrb[56].mxu1 %vm1237_vm5, %v4695_v27  ;;  %3415 = vmatmul.mubr.msk.bf16.gmra.mrb[56].mxu0 %vm1237_vm5, %v4748_v26  ;;  %v3767_v27 = vunpack.i.h.bf16 %v3765_v40 }
 0x144   : > { %3368 = vmatprep.mubr.msk.bf16.mxu1 %vm1237_vm5, %v4708_v55  ;;  %3418 = vmatprep.mubr.msk.bf16.mxu0 %vm1237_vm5, %v4779_v16  ;;  %v1176_v55 = vsel %vm1124_vm4, %v1121_v35, %v3771_v52 }
 0x145   : > { %v1813_v32 = vpack.c.bf16 %v1176_v55, %v4837_v46 }
 0x14b   : > { %3369 = vmatmul.mubr.msk.bf16.gmra.mrb[60].mxu1 %vm1237_vm5, %v4735_v20  ;;  %3419 = vmatmul.mubr.msk.bf16.gmra.mrb[60].mxu0 %vm1237_vm5, %v4792_v41  ;;  %v1123_v20 = vsel %vm1069_vm3, %v5573_v60, %v798_v13 }
 0x14c   : > { %3372 = vmatprep.mubr.msk.bf16.mxu1 %vm1237_vm5, %v4748_v26  ;;  %3422 = vmatprep.mubr.msk.bf16.mxu0 %vm1237_vm5, %v4825_v34  ;;  %v5574_v26 = vld [vmem:[#allocation15_spill] sm:$0xff]  ;;  %v1178_v4 = vsel %vm1124_vm4, %v1123_v20, %v1014_v19 }
 0x14d   : > { %v1122_v44 = vsel %vm1069_vm3, %v5574_v26, %v3767_v27  ;;  %vm2852_vm3 = vcmask 982016  }
 0x14e   : > { %v1177_v61 = vsel %vm1124_vm4, %v1122_v44, %v3772_v6 }
 0x14f   : > { %v1814_v18 = vpack.c.bf16 %v1178_v4, %v1177_v61  ;;  %v5025_v4 = vld [vmem:[%s5509_s3] ss:$0 sm:$0xff] }
 0x153   : > { %3373 = vmatmul.mubr.msk.bf16.gmra.mrb[64].mxu1 %vm1237_vm5, %v4779_v16  ;;  %3423 = vmatmul.mubr.msk.bf16.gmra.mrb[64].mxu0 %vm1237_vm5, %v1812_v56 }
 0x154   : > { %3376 = vmatprep.mubr.msk.bf16.mxu1 %vm1237_vm5, %v4792_v41  ;;  %3426 = vmatprep.mubr.msk.bf16.mxu0 %vm1237_vm5, %v1813_v32 }
 0x15b   : > { %3377 = vmatmul.mubr.msk.bf16.gmra.mrb[68].mxu1 %vm1237_vm5, %v4825_v34  ;;  %3427 = vmatmul.mubr.msk.bf16.gmra.mrb[68].mxu0 %vm1237_vm5, %v1814_v18 }
 0x179   : > { %v3308_v16 = vpop.f32.mrb[0].mxu1 }
 0x17a   : > { %v4970_v17 = vpop.f32.mrb[1].mxu1 }
 0x17b   : > { %v4972_v53 = vpop.f32.mrb[2].mxu1 }
 0x17c   : > { %v4974_v48 = vpop.f32.mrb[3].mxu1 }
 0x17e   : > { %v3284_v41 = vpop.f32.mrb[0].mxu0 }
 0x17f   : > { %v1348_v58 = vpop.f32.mrb[1].mxu0 }
 0x180   : > { %v3285_v22 = vpop.f32.mrb[2].mxu0 }
 0x181   : > { %v1351_v50 = vpop.f32.mrb[3].mxu0 }
 0x189   : > { %v4976_v46 = vpop.f32.mrb[4].mxu1 }
 0x18a   : > { %v4978_v56 = vpop.f32.mrb[5].mxu1 }
 0x18b   : > { %v4980_v59 = vpop.f32.mrb[6].mxu1 }
 0x18c   : > { %v1454_v34 = vpop.f32.mrb[7].mxu1 }
 0x18e   : > { %v3288_v47 = vpop.f32.mrb[4].mxu0 }
 0x18f   : > { %v1363_v24 = vpop.f32.mrb[5].mxu0 }
 0x190   : > { %v3289_v36 = vpop.f32.mrb[6].mxu0 }
 0x191   : > { %v1366_v57 = vpop.f32.mrb[7].mxu0 }
 0x199   : > { %v4982_v31 = vpop.f32.mrb[8].mxu1 }
 0x19a   : > { %v1466_v0 = vpop.f32.mrb[9].mxu1 }
 0x19b   : > { %v3317_v63 = vpop.f32.mrb[10].mxu1 }
 0x19c   : > { %v4984_v42 = vpop.f32.mrb[11].mxu1 }
 0x19e   : > { %v4986_v15 = vpop.f32.mrb[8].mxu0 }
 0x19f   : > { %v1378_v11 = vpop.f32.mrb[9].mxu0 }
 0x1a0   : > { %v3293_v33 = vpop.f32.mrb[10].mxu0 }
 0x1a1   : > { %v4988_v25 = vpop.f32.mrb[11].mxu0 }
 0x1a9   : > { %v3320_v51 = vpop.f32.mrb[12].mxu1 }
 0x1aa   : > { %v4990_v9 = vpop.f32.mrb[13].mxu1 }
 0x1ab   : > { %v4992_v49 = vpop.f32.mrb[14].mxu1 }
 0x1ac   : > { %v4994_v23 = vpop.f32.mrb[15].mxu1 }
 0x1ae   : > { %v3296_v8 = vpop.f32.mrb[12].mxu0 }
 0x1af   : > { %v4996_v29 = vpop.f32.mrb[13].mxu0 }
 0x1b0   : > { %v4998_v54 = vpop.f32.mrb[14].mxu0 }
 0x1b1   : > { %v5000_v45 = vpop.f32.mrb[15].mxu0 }
 0x1b9   : > { %v5002_v30 = vpop.f32.mrb[16].mxu1 }
 0x1ba   : > { %v5004_v10 = vpop.f32.mrb[17].mxu1 }
 0x1bb   : > { %v5006_v7 = vpop.f32.mrb[18].mxu1 }
 0x1bc   : > { %v1498_v14 = vpop.f32.mrb[19].mxu1 }
 0x1be   : > { %v5008_v37 = vpop.f32.mrb[16].mxu0 }
 0x1bf   : > { %v5010_v43 = vpop.f32.mrb[17].mxu0 }
 0x1c0   : > { %v5012_v28 = vpop.f32.mrb[18].mxu0 }
 0x1c1   : > { %v1410_v62 = vpop.f32.mrb[19].mxu0 }
 0x1c9   : > { %v5014_v21 = vpop.f32.mrb[20].mxu1 }
 0x1ca   : > { %v1510_v38 = vpop.f32.mrb[21].mxu1 }
 0x1cb   : > { %v3329_v39 = vpop.f32.mrb[22].mxu1 }
 0x1cc   : > { %v5016_v5 = vpop.f32.mrb[23].mxu1 }
 0x1ce   : > { %v5018_v12 = vpop.f32.mrb[20].mxu0 }
 0x1cf   : > { %v1422_v1 = vpop.f32.mrb[21].mxu0 }
 0x1d0   : > { %v3305_v40 = vpop.f32.mrb[22].mxu0 }
 0x1d1   : > { %v5020_v3 = vpop.f32.mrb[23].mxu0 }
 0x1d6   : > { %v3334_v2 = vpop.f32.mrb[24].mxu1  ;;  %v3384_v52 = vpop.f32.mrb[24].mxu0 }
 0x1d7   : > { %v1637_v35 = vpop.f32.mrb[25].mxu1  ;;  %v1869_v13 = vpop.f32.mrb[25].mxu0 }
 0x1d8   : > { %v1638_v27 = vadd.f32 %v1637_v35, %v1348_v58  ;;  %v3335_v55 = vpop.f32.mrb[26].mxu1  ;;  %v3385_v6 = vpop.f32.mrb[26].mxu0 }
 0x1d9   : > { %v1648_v32 = vadd.f32 %v3335_v55, %v3285_v22  ;;  %v1640_v60 = vpop.f32.mrb[27].mxu1  ;;  %v1872_v20 = vpop.f32.mrb[27].mxu0 }
 0x1da   : > { %v2044_v19 = vadd.f32 %v1869_v13, %v1638_v27  ;;  %v1641_v26 = vadd.f32 %v1640_v60, %v1351_v50 }
 0x1db   : > { %v2046_v44 = vadd.f32 %v3385_v6, %v1648_v32 }
 0x1dc   : > { %v2045_v61 = vadd.f32 %v1872_v20, %v1641_v26  ;;  %v2083_v22 = vadd.f32 %v5025_v4, %v2044_v19 }
 0x1de   : > { %v3338_v18 = vpop.f32.mrb[28].mxu1  ;;  %v3388_v16 = vpop.f32.mrb[28].mxu0  ;;  %v2084_v8 = vadd.f32 %v5025_v4, %v2045_v61  ;;  %v2115_v39 = vmax.f32 %v2083_v22, 0.0 }
 0x1df   : > { %v1660_v41 = vadd.f32 %v3338_v18, %v3288_v47  ;;  %v1652_v34 = vpop.f32.mrb[29].mxu1  ;;  %v1884_v57 = vpop.f32.mrb[29].mxu0 }
 0x1e0   : > { %v1653_v58 = vadd.f32 %v1652_v34, %v1363_v24  ;;  %v3339_v0 = vpop.f32.mrb[30].mxu1  ;;  %v3389_v63 = vpop.f32.mrb[30].mxu0  ;;  %v2116_v40 = vmax.f32 %v2084_v8, 0.0  ;;  %v3858_v24 = vmov 1983009808   ;;  %v5575_v8 = vld [vmem:[#allocation5_spill] sm:$0xff] }
 0x1e1   : > { %v2048_v11 = vadd.f32 %v3388_v16, %v1660_v41  ;;  %v1663_v33 = vadd.f32 %v3339_v0, %v3289_v36  ;;  %v1655_v50 = vpop.f32.mrb[31].mxu1  ;;  %v1887_v51 = vpop.f32.mrb[31].mxu0  ;;  %v2150_v2 = vunpack.c.l.s4 %v3858_v24 }
 0x1e2   : > { %v2047_v14 = vadd.f32 %v1884_v57, %v1653_v58  ;;  %v2085_v57 = vadd.f32 %v5025_v4, %v2046_v44 }
 0x1e3   : > { %v2087_v62 = vadd.f32 %v5025_v4, %v2048_v11  ;;  %v2049_v38 = vadd.f32 %v3389_v63, %v1663_v33  ;;  %v2151_v58 = vunpack.c.0.s8 %v2150_v2 }
 0x1e4   : > { %v2086_v16 = vadd.f32 %v5025_v4, %v2047_v14  ;;  %v2117_v51 = vmax.f32 %v2085_v57, 0.0 }
 0x1e5   : > { %v2119_v1 = vmax.f32 %v2087_v62, 0.0  ;;  %v2088_v47 = vadd.f32 %v5025_v4, %v2049_v38  ;;  %v5038_v62 = vsub.s32 %v2151_v58, %v5575_v8 }
 0x1e6   : > { %v3342_v52 = vpop.f32.mrb[32].mxu1  ;;  %v3392_v35 = vpop.f32.mrb[32].mxu0 }
 0x1e7   : > { %v2147_v13 = vcombine.low %v2115_v39, %v2119_v1  ;;  %v2148_v27 = vcombine.high %v2115_v39, %v2119_v1  ;;  %v2120_v36 = vmax.f32 %v2088_v47, 0.0  ;;  %v1675_v55 = vadd.f32 %v3342_v52, %v4986_v15  ;;  %v1667_v6 = vpop.f32.mrb[33].mxu1  ;;  %v1899_v32 = vpop.f32.mrb[33].mxu0 }
 0x1e8   : > { %v3343_v60 = vpop.f32.mrb[34].mxu1  ;;  %v3393_v20 = vpop.f32.mrb[34].mxu0  ;;  %v2118_v15 = vmax.f32 %v2086_v16, 0.0 }
 0x1e9   : > { %v2419_v19 = vcombine.low %v2116_v40, %v2120_v36  ;;  %v2420_v26 = vcombine.high %v2116_v40, %v2120_v36  ;;  %v1669_v61 = vpop.f32.mrb[35].mxu1  ;;  %v1901_v18 = vpop.f32.mrb[35].mxu0  ;;  %v2051_v41 = vadd.f32 %v3392_v35, %v1675_v55 }
 0x1ea   : > { %v1670_v34 = vadd.f32 %v1669_v61, %v4988_v25  ;;  %v5056_v61 = vrot.slane %v2147_v13, %v5038_v62 }
 0x1eb   : > { %v2090_v0 = vadd.f32 %v5025_v4, %v2051_v41  ;;  %v5042_v24 = vrot.slane %v2419_v19, %v5038_v62  ;;  %v5052_v60 = vrot.slane %v2420_v26, %v5038_v62 }
 0x1ec   : > { %v2050_v63 = vadd.f32 %v1901_v18, %v1670_v34 }
 0x1ed   : > { %v2122_v22 = vmax.f32 %v2090_v0, 0.0  ;;  %v5075_v0 = vrot.slane %v2148_v27, %v5038_v62 }
 0x1ee   : > { %v2089_v11 = vadd.f32 %v5025_v4, %v2050_v63  ;;  %v3346_v33 = vpop.f32.mrb[36].mxu1  ;;  %v3396_v50 = vpop.f32.mrb[36].mxu0 }
 0x1ef   : > { %v1681_v14 = vpop.f32.mrb[37].mxu1  ;;  %v1913_v38 = vpop.f32.mrb[37].mxu0  ;;  %v2435_v39 = vcombine.low %v2118_v15, %v2122_v22  ;;  %v2436_v25 = vcombine.high %v2118_v15, %v2122_v22 }
 0x1f0   : > { %v2121_v1 = vmax.f32 %v2089_v11, 0.0  ;;  %v1682_v44 = vadd.f32 %v1681_v14, %v4996_v29  ;;  %v3347_v47 = vpop.f32.mrb[38].mxu1  ;;  %v3397_v40 = vpop.f32.mrb[38].mxu0 }
 0x1f1   : > { %v1692_v2 = vadd.f32 %v3347_v47, %v4998_v54  ;;  %v1684_v52 = vpop.f32.mrb[39].mxu1  ;;  %v1916_v35 = vpop.f32.mrb[39].mxu0  ;;  %v5046_v36 = vrot.slane %v2435_v39, %v5038_v62  ;;  %v5049_v55 = vrot.slane %v2436_v25, %v5038_v62 }
 0x1f2   : > { %v2163_v6 = vcombine.low %v2117_v51, %v2121_v1  ;;  %v2164_v32 = vcombine.high %v2117_v51, %v2121_v1  ;;  %v2052_v29 = vadd.f32 %v1913_v38, %v1682_v44  ;;  %v1685_v19 = vadd.f32 %v1684_v52, %v5000_v45 }
 0x1f3   : > { %v2054_v20 = vadd.f32 %v3397_v40, %v1692_v2  ;;  %v2483_v18 = vcombine.low %v5042_v24, %v5046_v36  ;;  %v2484_v16 = vcombine.high %v5042_v24, %v5046_v36  ;;  %v2499_v34 = vcombine.low %v5052_v60, %v5049_v55 }
 0x1f4   : > { %v5059_v54 = vrot.slane %v2163_v6, %v5038_v62  ;;  %v5066_v41 = vrot.slane %v2164_v32, %v5038_v62  ;;  %v2053_v26 = vadd.f32 %v1916_v35, %v1685_v19  ;;  %v3859_v51 = vmov 1934713408  }
 0x1f5   : > { %v2214_v14 = vunpack.c.l.s4 %v3859_v51  ;;  %v2091_v38 = vadd.f32 %v5025_v4, %v2052_v29  ;;  %v2500_v40 = vcombine.high %v5052_v60, %v5049_v55 }
 0x1f6   : > { %v3350_v45 = vpop.f32.mrb[40].mxu1  ;;  %v3400_v57 = vpop.f32.mrb[40].mxu0  ;;  %v2211_v13 = vcombine.low %v5056_v61, %v5059_v54  ;;  %v2212_v58 = vcombine.high %v5056_v61, %v5059_v54  ;;  %v2227_v27 = vcombine.low %v5075_v0, %v5066_v41 }
 0x1f7   : > { %v1704_v63 = vadd.f32 %v3350_v45, %v5008_v37  ;;  %v1696_v15 = vpop.f32.mrb[41].mxu1  ;;  %v1928_v22 = vpop.f32.mrb[41].mxu0  ;;  %v2092_v37 = vadd.f32 %v5025_v4, %v2053_v26  ;;  %v2123_v35 = vmax.f32 %v2091_v38, 0.0  ;;  %v2215_v45 = vunpack.c.0.s8 %v2214_v14 }
 0x1f8   : > { %v1697_v11 = vadd.f32 %v1696_v15, %v5010_v43  ;;  %v3351_v33 = vpop.f32.mrb[42].mxu1  ;;  %v3401_v50 = vpop.f32.mrb[42].mxu0  ;;  %v2228_v43 = vcombine.high %v5075_v0, %v5066_v41  ;;  %v2093_v14 = vadd.f32 %v5025_v4, %v2054_v20 }
 0x1f9   : > { %v2056_v39 = vadd.f32 %v3400_v57, %v1704_v63  ;;  %v1707_v25 = vadd.f32 %v3351_v33, %v5012_v28  ;;  %v1699_v1 = vpop.f32.mrb[43].mxu1  ;;  %v1931_v44 = vpop.f32.mrb[43].mxu0  ;;  %v2124_v32 = vmax.f32 %v2092_v37, 0.0 }
 0x1fa   : > { %v2055_v47 = vadd.f32 %v1928_v22, %v1697_v11 }
 0x1fb   : > { %v2095_v2 = vadd.f32 %v5025_v4, %v2056_v39  ;;  %v2057_v52 = vadd.f32 %v3401_v50, %v1707_v25 }
 0x1fc   : > { %v2094_v1 = vadd.f32 %v5025_v4, %v2055_v47 }
 0x1fd   : > { %v2127_v6 = vmax.f32 %v2095_v2, 0.0  ;;  %v2096_v28 = vadd.f32 %v5025_v4, %v2057_v52  ;;  %v5097_v2 = vsub.s32 %v2215_v45, %v5575_v8 }
 0x1fe   : > { %v3354_v29 = vpop.f32.mrb[44].mxu1  ;;  %v3404_v19 = vpop.f32.mrb[44].mxu0 }
 0x1ff   : > { %v2179_v57 = vcombine.low %v2123_v35, %v2127_v6  ;;  %v5090_v26 = vcombine.high %v2123_v35, %v2127_v6  ;;  %v2128_v63 = vmax.f32 %v2096_v28, 0.0  ;;  %v1719_v15 = vadd.f32 %v3354_v29, %v5018_v12  ;;  %v1711_v22 = vpop.f32.mrb[45].mxu1  ;;  %v1943_v11 = vpop.f32.mrb[45].mxu0 }
 0x200   : > { %v3355_v33 = vpop.f32.mrb[46].mxu1  ;;  %v3405_v51 = vpop.f32.mrb[46].mxu0  ;;  %v2126_v35 = vmax.f32 %v2094_v1, 0.0  ;;  %v5111_v8 = vrot.slane %v2484_v16, %v5097_v2  ;;  %v5114_v20 = vrot.slane %v2499_v34, %v5097_v2  ;;  %v5123_v24 = vrot.slane %v2211_v13, %v5097_v2 }
 0x201   : > { %v2451_v39 = vcombine.low %v2124_v32, %v2128_v63  ;;  %v2452_v50 = vcombine.high %v2124_v32, %v2128_v63  ;;  %v1713_v38 = vpop.f32.mrb[47].mxu1  ;;  %v1945_v25 = vpop.f32.mrb[47].mxu0  ;;  %v2059_v44 = vadd.f32 %v3404_v19, %v1719_v15  ;;  %v2125_v63 = vmax.f32 %v2093_v14, 0.0 }
 0x202   : > { %v1714_v37 = vadd.f32 %v1713_v38, %v5020_v3  ;;  %v5105_v3 = vrot.slane %v2483_v18, %v5097_v2  ;;  %v5129_v36 = vrot.slane %v2212_v58, %v5097_v2  ;;  %v2187_v14 = vrot.slane %v2179_v57, %v5038_v62 }
 0x203   : > { %v2098_v12 = vadd.f32 %v5025_v4, %v2059_v44  ;;  %v2459_v38 = vrot.slane %v2451_v39, %v5038_v62  ;;  %v5136_v39 = vrot.slane %v2452_v50, %v5038_v62  ;;  %v5149_v50 = vrot.slane %v2227_v27, %v5097_v2 }
 0x204   : > { %v2058_v52 = vadd.f32 %v1945_v25, %v1714_v37 }
 0x205   : > { %v2130_v6 = vmax.f32 %v2098_v12, 0.0 }
 0x206   : > { %v2097_v28 = vadd.f32 %v5025_v4, %v2058_v52  ;;  %v3358_v32 = vpop.f32.mrb[48].mxu1  ;;  %v3408_v29 = vpop.f32.mrb[48].mxu0 }
 0x207   : > { %v1725_v22 = vpop.f32.mrb[49].mxu1  ;;  %v1957_v47 = vpop.f32.mrb[49].mxu0  ;;  %v2467_v19 = vcombine.low %v2126_v35, %v2130_v6  ;;  %v2468_v45 = vcombine.high %v2126_v35, %v2130_v6 }
 0x208   : > { %v2129_v15 = vmax.f32 %v2097_v28, 0.0  ;;  %v1726_v11 = vadd.f32 %v1725_v22, %v4970_v17  ;;  %v3359_v33 = vpop.f32.mrb[50].mxu1  ;;  %v3409_v51 = vpop.f32.mrb[50].mxu0 }
 0x209   : > { %v1736_v18 = vadd.f32 %v3359_v33, %v4972_v53  ;;  %v1728_v25 = vpop.f32.mrb[51].mxu1  ;;  %v1960_v1 = vpop.f32.mrb[51].mxu0  ;;  %v2475_v17 = vrot.slane %v2467_v19, %v5038_v62  ;;  %v5133_v16 = vrot.slane %v2468_v45, %v5038_v62 }
 0x20a   : > { %v2195_v53 = vcombine.low %v2125_v63, %v2129_v15  ;;  %v2196_v34 = vcombine.high %v2125_v63, %v2129_v15  ;;  %v2060_v44 = vadd.f32 %v1957_v47, %v1726_v11  ;;  %v1729_v13 = vadd.f32 %v1728_v25, %v4974_v48 }
 0x20b   : > { %v5138_v37 = vadd.f32 %v3409_v51, %v1736_v18  ;;  %v2515_v54 = vcombine.low %v2459_v38, %v2475_v17  ;;  %v2516_v58 = vcombine.high %v2459_v38, %v2475_v17  ;;  %v2531_v52 = vcombine.low %v5136_v39, %v5133_v16 }
 0x20c   : > { %v2203_v61 = vrot.slane %v2195_v53, %v5038_v62  ;;  %v2061_v12 = vadd.f32 %v1960_v1, %v1729_v13  ;;  %v5155_v48 = vrot.slane %v2228_v43, %v5097_v2  ;;  %v2194_v63 = vrot.slane %v5090_v26, %v5038_v62 }
 0x20d   : > { %v2523_v6 = vrot.slane %v2515_v54, %v5097_v2  ;;  %v5159_v28 = vrot.slane %v2516_v58, %v5097_v2  ;;  %v2210_v27 = vrot.slane %v2196_v34, %v5038_v62  ;;  %v2099_v22 = vadd.f32 %v5025_v4, %v2060_v44 }
 0x20e   : > { %v3362_v57 = vpop.f32.mrb[52].mxu1  ;;  %v3412_v35 = vpop.f32.mrb[52].mxu0  ;;  %v2243_v32 = vcombine.low %v2187_v14, %v2203_v61  ;;  %v2244_v29 = vcombine.high %v2187_v14, %v2203_v61  ;;  %v2100_v26 = vadd.f32 %v5025_v4, %v2061_v12  ;;  %v5177_v1 = vrot.slane %v2531_v52, %v5097_v2 }
 0x20f   : > { %v1748_v41 = vadd.f32 %v3362_v57, %v4976_v46  ;;  %v1740_v0 = vpop.f32.mrb[53].mxu1  ;;  %v1972_v43 = vpop.f32.mrb[53].mxu0  ;;  %v2547_v15 = vcombine.low %v5105_v3, %v2523_v6  ;;  %v2548_v11 = vcombine.high %v5105_v3, %v2523_v6  ;;  %v2549_v33 = vcombine.low %v5111_v8, %v5159_v28 }
 0x210   : > { %v1741_v47 = vadd.f32 %v1740_v0, %v4978_v56  ;;  %v3363_v19 = vpop.f32.mrb[54].mxu1  ;;  %v3413_v45 = vpop.f32.mrb[54].mxu0  ;;  %v2550_v25 = vcombine.high %v5111_v8, %v5159_v28  ;;  %v5180_v3 = vrot.slane %v2243_v32, %v5097_v2  ;;  %v5183_v17 = vrot.slane %v2244_v29, %v5097_v2 }
 0x211   : > { %v2064_v51 = vadd.f32 %v3412_v35, %v1748_v41  ;;  %v1751_v38 = vadd.f32 %v3363_v19, %v4980_v59  ;;  %v1743_v18 = vpop.f32.mrb[55].mxu1  ;;  %v1975_v46 = vpop.f32.mrb[55].mxu0  ;;  %2749 = vrot.lane.b32.xlu0 %v2547_v15, %s3860_s6  ;;  %v2259_v34 = vcombine.low %v2194_v63, %v2210_v27  ;;  %v2260_v44 = vcombine.high %v2194_v63, %v2210_v27 }
 0x212   : > { %v2063_v56 = vadd.f32 %v1972_v43, %v1741_v47  ;;  %v2131_v13 = vmax.f32 %v2099_v22, 0.0  ;;  %v2551_v8 = vcombine.low %v5114_v20, %v5177_v1  ;;  %v2552_v14 = vcombine.high %v5114_v20, %v5177_v1 }
 0x213   : > { %v2103_v59 = vadd.f32 %v5025_v4, %v2064_v51  ;;  %v2065_v53 = vadd.f32 %v3413_v45, %v1751_v38  ;;  %v2276_v61 = vcombine.high %v5123_v24, %v5180_v3  ;;  %v2277_v12 = vcombine.low %v5129_v36, %v5183_v17 }
 0x214   : > { %v2278_v52 = vcombine.high %v5129_v36, %v5183_v17  ;;  %v2132_v57 = vmax.f32 %v2100_v26, 0.0  ;;  %v5199_v28 = vrot.slane %v2259_v34, %v5097_v2  ;;  %v5202_v32 = vrot.slane %v2260_v44, %v5097_v2 }
 0x215   : > { %v2135_v54 = vmax.f32 %v2103_v59, 0.0  ;;  %v2104_v58 = vadd.f32 %v5025_v4, %v2065_v53  ;;  %2757 = vrot.lane.b32.xlu0 %v2548_v11, %s3861_s7  ;;  %v2532_v29 = vcombine.high %v5136_v39, %v5133_v16  ;;  %v2102_v39 = vadd.f32 %v5025_v4, %v2063_v56 }
 0x216   : > { %v3366_v35 = vpop.f32.mrb[56].mxu1  ;;  %v3416_v6 = vpop.f32.mrb[56].mxu0  ;;  %v2279_v45 = vcombine.low %v5149_v50, %v5199_v28  ;;  %v2280_v15 = vcombine.high %v5149_v50, %v5199_v28  ;;  %v2281_v11 = vcombine.low %v5155_v48, %v5202_v32  ;;  %v2282_v16 = vcombine.high %v5155_v48, %v5202_v32 }
 0x217   : > { %v2283_v63 = vcombine.low %v2131_v13, %v2135_v54  ;;  %v5206_v27 = vcombine.high %v2131_v13, %v2135_v54  ;;  %v2136_v22 = vmax.f32 %v2104_v58, 0.0  ;;  %v1763_v41 = vadd.f32 %v3366_v35, %v4982_v31  ;;  %v1755_v0 = vpop.f32.mrb[57].mxu1  ;;  %v1987_v43 = vpop.f32.mrb[57].mxu0 }
 0x218   : > { %v3367_v47 = vpop.f32.mrb[58].mxu1  ;;  %v3417_v19 = vpop.f32.mrb[58].mxu0  ;;  %v5222_v18 = vrot.slane %v2500_v40, %v5097_v2  ;;  %v5227_v53 = vrot.slane %v2532_v29, %v5097_v2  ;;  %v2275_v56 = vcombine.low %v5123_v24, %v5180_v3  ;;  %v2101_v34 = vadd.f32 %v5025_v4, %v5138_v37 }
 0x219   : > { %v2555_v26 = vcombine.low %v2132_v57, %v2136_v22  ;;  %v2556_v31 = vcombine.high %v2132_v57, %v2136_v22  ;;  %v1757_v51 = vpop.f32.mrb[59].mxu1  ;;  %v1989_v38 = vpop.f32.mrb[59].mxu0  ;;  %v2067_v46 = vadd.f32 %v3416_v6, %v1763_v41  ;;  %2765 = vrot.lane.b32.xlu0 %v2549_v33, %s3862_s9  ;;  %v2134_v40 = vmax.f32 %v2102_v39, 0.0 }
 0x21a   : > { %v1758_v59 = vadd.f32 %v1757_v51, %v4984_v42  ;;  %v2553_v60 = vcombine.low %v5222_v18, %v5227_v53  ;;  %v2554_v42 = vcombine.high %v5222_v18, %v5227_v53  ;;  %v2133_v57 = vmax.f32 %v2101_v34, 0.0 }
 0x21b   : > { %v2106_v44 = vadd.f32 %v5025_v4, %v2067_v46  ;;  %v5242_v47 = vrot.slane %v2555_v26, %v5038_v62 }
 0x21c   : > { %v2066_v55 = vadd.f32 %v1989_v38, %v1758_v59 }
 0x21d   : > { %v2138_v33 = vmax.f32 %v2106_v44, 0.0  ;;  %2773 = vrot.lane.b32.xlu0 %v2550_v25, %s3863_s10  ;;  %v5260_v44 = vrot.slane %v2283_v63, %v5038_v62 }
 0x21e   : > { %v2105_v13 = vadd.f32 %v5025_v4, %v2066_v55  ;;  %v3370_v54 = vpop.f32.mrb[60].mxu1  ;;  %v3420_v58 = vpop.f32.mrb[60].mxu0 }
 0x21f   : > { %v1769_v37 = vpop.f32.mrb[61].mxu1  ;;  %v2001_v35 = vpop.f32.mrb[61].mxu0  ;;  %v2571_v6 = vcombine.low %v2134_v40, %v2138_v33  ;;  %v2572_v29 = vcombine.high %v2134_v40, %v2138_v33 }
 0x220   : > { %v2137_v22 = vmax.f32 %v2105_v13, 0.0  ;;  %v1770_v41 = vadd.f32 %v1769_v37, %v4990_v9  ;;  %v3371_v0 = vpop.f32.mrb[62].mxu1  ;;  %v3421_v43 = vpop.f32.mrb[62].mxu0  ;;  %v5256_v9 = vrot.slane %v2556_v31, %v5038_v62 }
 0x221   : > { %v1780_v19 = vadd.f32 %v3371_v0, %v4992_v49  ;;  %v1772_v39 = vpop.f32.mrb[63].mxu1  ;;  %v2004_v51 = vpop.f32.mrb[63].mxu0  ;;  %v5246_v25 = vrot.slane %v2571_v6, %v5038_v62  ;;  %v5249_v38 = vrot.slane %v2572_v29, %v5038_v62  ;;  %2781 = vrot.lane.b32.xlu0 %v2551_v8, %s3864_s11 }
 0x222   : > { %v2299_v46 = vcombine.low %v2133_v57, %v2137_v22  ;;  %v2300_v59 = vcombine.high %v2133_v57, %v2137_v22  ;;  %v2068_v49 = vadd.f32 %v2001_v35, %v1770_v41  ;;  %v1773_v34 = vadd.f32 %v1772_v39, %v4994_v23 }
 0x223   : > { %v2070_v26 = vadd.f32 %v3421_v43, %v1780_v19  ;;  %v2619_v40 = vcombine.low %v5242_v47, %v5246_v25  ;;  %v2620_v33 = vcombine.high %v5242_v47, %v5246_v25  ;;  %v2635_v13 = vcombine.low %v5256_v9, %v5249_v38 }
 0x224   : > { %v5263_v55 = vrot.slane %v2299_v46, %v5038_v62  ;;  %v5270_v8 = vrot.slane %v2300_v59, %v5038_v62  ;;  %v2069_v31 = vadd.f32 %v2004_v51, %v1773_v34  ;;  %v5284_v57 = vrot.slane %v5206_v27, %v5038_v62 }
 0x225   : > { %2789 = vrot.lane.b32.xlu0 %v2552_v14, %s3865_s12  ;;  %v2107_v14 = vadd.f32 %v5025_v4, %v2068_v49  ;;  %v5329_v36 = vrot.slane %v2620_v33, %v5097_v2 }
 0x226   : > { %v3374_v23 = vpop.f32.mrb[64].mxu1  ;;  %v3424_v63 = vpop.f32.mrb[64].mxu0  ;;  %v2347_v54 = vcombine.low %v5260_v44, %v5263_v55  ;;  %v2348_v58 = vcombine.high %v5260_v44, %v5263_v55  ;;  %v2363_v19 = vcombine.low %v5284_v57, %v5270_v8  ;;  %v2108_v27 = vadd.f32 %v5025_v4, %v2069_v31 }
 0x227   : > { %v1792_v37 = vadd.f32 %v3374_v23, %v5002_v30  ;;  %v1784_v35 = vpop.f32.mrb[65].mxu1  ;;  %v2016_v6 = vpop.f32.mrb[65].mxu0  ;;  %v2364_v30 = vcombine.high %v5284_v57, %v5270_v8  ;;  %v2139_v46 = vmax.f32 %v2107_v14, 0.0 }
 0x228   : > { %v1785_v29 = vadd.f32 %v1784_v35, %v5004_v10  ;;  %v3375_v20 = vpop.f32.mrb[66].mxu1  ;;  %v3425_v1 = vpop.f32.mrb[66].mxu0  ;;  %v2636_v10 = vcombine.high %v5256_v9, %v5249_v38  ;;  %v2140_v34 = vmax.f32 %v2108_v27, 0.0  ;;  %v5346_v47 = vrot.slane %v2348_v58, %v5097_v2 }
 0x229   : > { %v2072_v22 = vadd.f32 %v3424_v63, %v1792_v37  ;;  %v1795_v41 = vadd.f32 %v3375_v20, %v5006_v7  ;;  %v1787_v0 = vpop.f32.mrb[67].mxu1  ;;  %v2019_v43 = vpop.f32.mrb[67].mxu0  ;;  %2693 = vrot.lane.b32.xlu0 %v2276_v61, %s3856_s8  ;;  %v2371_v44 = vrot.slane %v2363_v19, %v5097_v2  ;;  %v2378_v55 = vrot.slane %v2364_v30, %v5097_v2 }
 0x22a   : > { %v2071_v39 = vadd.f32 %v2016_v6, %v1785_v29  ;;  %v2650_v50 = vrot.slane %v2636_v10, %v5097_v2 }
 0x22b   : > { %v2111_v7 = vadd.f32 %v5025_v4, %v2072_v22  ;;  %v2073_v51 = vadd.f32 %v3425_v1, %v1795_v41 }
 0x22c   : > { %v2110_v41 = vadd.f32 %v5025_v4, %v2071_v39 }
 0x22d   : > { %v2143_v59 = vmax.f32 %v2111_v7, 0.0  ;;  %v2112_v49 = vadd.f32 %v5025_v4, %v2073_v51  ;;  %2701 = vrot.lane.b32.xlu0 %v2277_v12, %s3866_s13 }
 0x22e   : > { %v3378_v61 = vpop.f32.mrb[68].mxu1  ;;  %v3428_v31 = vpop.f32.mrb[68].mxu0  ;;  %v2142_v7 = vmax.f32 %v2110_v41, 0.0 }
 0x22f   : > { %v2315_v8 = vcombine.low %v2139_v46, %v2143_v59  ;;  %v2316_v23 = vcombine.high %v2139_v46, %v2143_v59  ;;  %v2144_v63 = vmax.f32 %v2112_v49, 0.0  ;;  %v1807_v57 = vadd.f32 %v3378_v61, %v5014_v21  ;;  %v1799_v37 = vpop.f32.mrb[69].mxu1  ;;  %v2031_v35 = vpop.f32.mrb[69].mxu0 }
 0x230   : > { %v3379_v6 = vpop.f32.mrb[70].mxu1  ;;  %v3429_v29 = vpop.f32.mrb[70].mxu0  ;;  %v2109_v21 = vadd.f32 %v5025_v4, %v2070_v26 }
 0x231   : > { %v2587_v20 = vcombine.low %v2140_v34, %v2144_v63  ;;  %v2588_v1 = vcombine.high %v2140_v34, %v2144_v63  ;;  %v1801_v14 = vpop.f32.mrb[71].mxu1  ;;  %v2033_v22 = vpop.f32.mrb[71].mxu0  ;;  %v2075_v0 = vadd.f32 %v3428_v31, %v1807_v57  ;;  %2709 = vrot.lane.b32.xlu0 %v2278_v52, %s3867_s14  ;;  %v2323_v38 = vrot.slane %v2315_v8, %v5038_v62 }
 0x232   : > { %v1802_v12 = vadd.f32 %v1801_v14, %v5016_v5  ;;  %v2627_v5 = vrot.slane %v2619_v40, %v5097_v2  ;;  %v2141_v17 = vmax.f32 %v2109_v21, 0.0  ;;  %v5340_v40 = vrot.slane %v2347_v54, %v5097_v2 }
 0x233   : > { %v2114_v43 = vadd.f32 %v5025_v4, %v2075_v0  ;;  %v2595_v39 = vrot.slane %v2587_v20, %v5038_v62  ;;  %v2602_v9 = vrot.slane %v2588_v1, %v5038_v62  ;;  %v2330_v61 = vrot.slane %v2316_v23, %v5038_v62 }
 0x234   : > { %v2074_v27 = vadd.f32 %v2033_v22, %v1802_v12 }
 0x235   : > { %v2146_v51 = vmax.f32 %v2114_v43, 0.0  ;;  %2717 = vrot.lane.b32.xlu0 %v2279_v45, %s3868_s21  ;;  %v2643_v45 = vrot.slane %v2635_v13, %v5097_v2 }
 0x236   : > { %v2113_v46 = vadd.f32 %v5025_v4, %v2074_v27 }
 0x237   : > { %v2603_v52 = vcombine.low %v2142_v7, %v2146_v51  ;;  %v2604_v4 = vcombine.high %v2142_v7, %v2146_v51 }
 0x238   : > { %v2145_v26 = vmax.f32 %v2113_v46, 0.0 }
 0x239   : > { %v2611_v25 = vrot.slane %v2603_v52, %v5038_v62  ;;  %v2618_v33 = vrot.slane %v2604_v4, %v5038_v62  ;;  %2725 = vrot.lane.b32.xlu0 %v2280_v15, %s3869_s22 }
 0x23a   : > { %v2331_v59 = vcombine.low %v2141_v17, %v2145_v26  ;;  %v2332_v49 = vcombine.high %v2141_v17, %v2145_v26 }
 0x23b   : > { %v2651_v58 = vcombine.low %v2595_v39, %v2611_v25  ;;  %v2652_v34 = vcombine.high %v2595_v39, %v2611_v25  ;;  %v2667_v31 = vcombine.low %v2602_v9, %v2618_v33  ;;  %v2668_v28 = vcombine.high %v2602_v9, %v2618_v33 }
 0x23c   : > { %v2339_v13 = vrot.slane %v2331_v59, %v5038_v62  ;;  %v2346_v54 = vrot.slane %v2332_v49, %v5038_v62 }
 0x23d   : > { %2733 = vrot.lane.b32.xlu0 %v2281_v11, %s3870_s24  ;;  %v2659_v15 = vrot.slane %v2651_v58, %v5097_v2  ;;  %v2666_v19 = vrot.slane %v2652_v34, %v5097_v2  ;;  %v2675_v63 = vrot.slane %v2667_v31, %v5097_v2  ;;  %v2682_v23 = vrot.slane %v2668_v28, %v5097_v2 }
 0x23e   : > { %v2379_v30 = vcombine.low %v2323_v38, %v2339_v13  ;;  %v2380_v8 = vcombine.high %v2323_v38, %v2339_v13  ;;  %v2395_v57 = vcombine.low %v2330_v61, %v2346_v54  ;;  %v2396_v62 = vcombine.high %v2330_v61, %v2346_v54 }
 0x23f   : > { %v2683_v10 = vcombine.low %v2627_v5, %v2659_v15  ;;  %v2684_v37 = vcombine.high %v2627_v5, %v2659_v15  ;;  %v2685_v35 = vcombine.low %v5329_v36, %v2666_v19  ;;  %v2686_v6 = vcombine.high %v5329_v36, %v2666_v19 }
 0x240   : > { %v2687_v29 = vcombine.low %v2643_v45, %v2675_v63  ;;  %v2688_v11 = vcombine.high %v2643_v45, %v2675_v63  ;;  %v5373_v20 = vrot.slane %v2379_v30, %v5097_v2  ;;  %v2394_v1 = vrot.slane %v2380_v8, %v5097_v2 }
 0x241   : > { %2751 = vrot.lane.b32.xlu1 %v2683_v10, %s3860_s6  ;;  %2741 = vrot.lane.b32.xlu0 %v2282_v16, %s3871_s26  ;;  %v2403_v14 = vrot.slane %v2395_v57, %v5097_v2  ;;  %v2410_v22 = vrot.slane %v2396_v62, %v5097_v2  ;;  %v2689_v41 = vcombine.low %v2650_v50, %v2682_v23  ;;  %s2981_s6 = sshll.u32 %s268_s5, 4 }
 0x242   : > { %v2412_v0 = vcombine.high %v5340_v40, %v5373_v20  ;;  %v2413_v12 = vcombine.low %v5346_v47, %v2394_v1  ;;  %v2414_v21 = vcombine.high %v5346_v47, %v2394_v1  ;;  %v2690_v43 = vcombine.high %v2650_v50, %v2682_v23 }
 0x243   : > { %v2415_v27 = vcombine.low %v2371_v44, %v2403_v14  ;;  %v2416_v7 = vcombine.high %v2371_v44, %v2403_v14  ;;  %v2417_v51 = vcombine.low %v2378_v55, %v2410_v22  ;;  %v2418_v46 = vcombine.high %v2378_v55, %v2410_v22 }
 0x244   : > { %v2411_v48 = vcombine.low %v5340_v40, %v5373_v20 }
 0x245   : > { %2759 = vrot.lane.b32.xlu1 %v2684_v37, %s3861_s7  ;;  %2797 = vrot.lane.b32.xlu0 %v2553_v60, %s3872_s29  ;;  %s5426_s7 = scalar_lea.vmem [#allocation2], %s2981_s6 }
 0x249   : > { %2767 = vrot.lane.b32.xlu1 %v2685_v35, %s3862_s9  ;;  %2805 = vrot.lane.b32.xlu0 %v2554_v42, %s3873_s30  ;;  %s2873_s9 = sshll.u32 %s5426_s7, 4  ;;  %s5446_s9 = int_to_ptr.vmem [resolvable:$true] %s2873_s9 }
 0x24d   : > { %2775 = vrot.lane.b32.xlu1 %v2686_v6, %s3863_s10  ;;  %s3071_s10 = sshll.u32 %s3846_s18, 8  ;;  %s5459_s18 = scalar_lea.sflag [#allocation3], %s268_s5 }
 0x251   : > { %2783 = vrot.lane.b32.xlu1 %v2687_v29, %s3864_s11 }
 0x255   : > { %2791 = vrot.lane.b32.xlu1 %v2688_v11, %s3865_s12 }
 0x259   : > { %2695 = vrot.lane.b32.xlu1 %v2412_v0, %s3856_s8 }
 0x25d   : > { %2703 = vrot.lane.b32.xlu1 %v2413_v12, %s3866_s13  ;;  %s5453_s13 = scalar_lea.hbm %s5510_s4, %s3071_s10 }
 0x261   : > { %2711 = vrot.lane.b32.xlu1 %v2414_v21, %s3867_s14  ;;  %s3776_s14 = scalar_lea.vmem %s5446_s9, 256 }
 0x262   : > { %p3777_p12 = scmp.ne.s32.totalorder %s5446_s9, %s3776_s14 }
 0x264   : > { %p3778_p13 = pnand %p3777_p12, %p3941_p4 }
 0x265   : > { %2719 = vrot.lane.b32.xlu1 %v2415_v27, %s3868_s21  ;;  %s3874_s21 = smov [#allocation2]  }
 0x266   : > { %p3779_p0 = pneg %p3778_p13 }
 0x269   : > { %2727 = vrot.lane.b32.xlu1 %v2416_v7, %s3869_s22  ;;  %s3780_s22 = sshll.u32 %s3874_s21, 4  ;;  %s3781_s22 = int_to_ptr.vmem [resolvable:$false] %s3780_s22 }
 0x26a   : > { %p3783_p1 = scmp.lt.s32.totalorder %s5446_s9, %s3781_s22 }
 0x26d   : > { %2735 = vrot.lane.b32.xlu1 %v2417_v51, %s3870_s24  ;;  %s3782_s24 = scalar_lea.vmem %s3781_s22, 512 }
 0x26e   : > { %p3784_p2 = scmp.lt.s32.totalorder %s3782_s24, %s3776_s14 }
 0x270   : > { %p3785_p3 = por %p3784_p2, %p3783_p1 }
 0x271   : > { %2743 = vrot.lane.b32.xlu1 %v2418_v46, %s3871_s26 }
 0x272   : > { %p3786_p5 = pnand %p3785_p3, %p3779_p0 }
 0x275   : > { %2799 = vrot.lane.b32.xlu1 %v2689_v41, %s3872_s29 }
 0x279   : > { %2807 = vrot.lane.b32.xlu1 %v2690_v43, %s3873_s30 }
 0x283   : > { %v2750_v2 = vpop.permute.xlu0 %2749 }
 0x287   : > { %v2758_v32 = vpop.permute.xlu0 %2757 }
 0x28b   : > { %v2766_v16 = vpop.permute.xlu0 %2765 }
 0x28f   : > { %v2774_v18 = vpop.permute.xlu0 %2773 }
 0x293   : > { %v2782_v53 = vpop.permute.xlu0 %2781 }
 0x297   : > { %v2790_v60 = vpop.permute.xlu0 %2789 }
 0x29b   : > { %v2694_v42 = vpop.permute.xlu0 %2693 }
 0x29c   : > { %v2811_v4 = vsel %vm1124_vm4, %v2275_v56, %v2694_v42 }
 0x29f   : > { %v2702_v5 = vpop.permute.xlu0 %2701 }
 0x2a0   : > { %v2814_v26 = vsel %vm2813_vm6, %v2811_v4, %v2702_v5 }
 0x2a3   : > { %v2710_v36 = vpop.permute.xlu0 %2709 }
 0x2a4   : > { %v2817_v45 = vsel %vm2816_vm7, %v2814_v26, %v2710_v36 }
 0x2a7   : > { %v2718_v17 = vpop.permute.xlu0 %2717 }
 0x2a8   : > { %v2820_v47 = vsel %vm2819_vm8, %v2817_v45, %v2718_v17 }
 0x2ab   : > { %v2726_v52 = vpop.permute.xlu0 %2725 }
 0x2ac   : > { %v2823_v25 = vsel %vm2822_vm9, %v2820_v47, %v2726_v52 }
 0x2af   : > { %v2734_v39 = vpop.permute.xlu0 %2733 }
 0x2b0   : > { %v2826_v24 = vsel %vm2825_vm10, %v2823_v25, %v2734_v39 }
 0x2b3   : > { %v2752_v3 = vpop.permute.xlu1 %2751  ;;  %v2742_v56 = vpop.permute.xlu0 %2741 }
 0x2b4   : > { %v2829_v33 = vsel %vm2828_vm11, %v2826_v24, %v2742_v56 }
 0x2b5   : > { %v2832_v59 = vsel %vm2831_vm12, %v2829_v33, %v2750_v2 }
 0x2b6   : > { %v2835_v49 = vsel %vm2834_vm13, %v2832_v59, %v2758_v32 }
 0x2b7   : > { %v2838_v38 = vsel %vm2837_vm14, %v2835_v49, %v2766_v16  ;;  %v2760_v9 = vpop.permute.xlu1 %2759  ;;  %v2798_v44 = vpop.permute.xlu0 %2797 }
 0x2b8   : > { %v2841_v55 = vsel %vm2840_vm15, %v2838_v38, %v2774_v18 }
 0x2b9   : > { %v2844_v13 = vsel %vm2843_vm0, %v2841_v55, %v2782_v53 }
 0x2ba   : > { %v2847_v54 = vsel %vm2846_vm1, %v2844_v13, %v2790_v60 }
 0x2bb   : > { %v2850_v58 = vsel %vm2849_vm2, %v2847_v54, %v2798_v44  ;;  %v2768_v34 = vpop.permute.xlu1 %2767  ;;  %v2806_v61 = vpop.permute.xlu0 %2805 }
 0x2bc   : > { %v2853_v31 = vsel %vm2852_vm3, %v2850_v58, %v2806_v61 }
 0x2bd   : > { %2855 = vst [vmem:[%s5426_s7] sm:$0xff] %v2853_v31 }
 0x2bf   : > { %v2776_v50 = vpop.permute.xlu1 %2775 }
 0x2c3   : > { %v2784_v28 = vpop.permute.xlu1 %2783 }
 0x2c7   : > { %v2792_v15 = vpop.permute.xlu1 %2791 }
 0x2cb   : > { %v2696_v19 = vpop.permute.xlu1 %2695 }
 0x2cc   : > { %v2812_v62 = vsel %vm1124_vm4, %v2411_v48, %v2696_v19 }
 0x2cf   : > { %v2704_v30 = vpop.permute.xlu1 %2703 }
 0x2d0   : > { %v2815_v23 = vsel %vm2813_vm6, %v2812_v62, %v2704_v30 }
 0x2d3   : > { %v2712_v8 = vpop.permute.xlu1 %2711 }
 0x2d4   : > { %v2818_v37 = vsel %vm2816_vm7, %v2815_v23, %v2712_v8 }
 0x2d7   : > { %v2720_v63 = vpop.permute.xlu1 %2719 }
 0x2d8   : > { %v2821_v35 = vsel %vm2819_vm8, %v2818_v37, %v2720_v63 }
 0x2db   : > { %v2728_v57 = vpop.permute.xlu1 %2727 }
 0x2dc   : > { %v2824_v6 = vsel %vm2822_vm9, %v2821_v35, %v2728_v57 }
 0x2df   : > { %v2736_v10 = vpop.permute.xlu1 %2735 }
 0x2e0   : > { %v2827_v29 = vsel %vm2825_vm10, %v2824_v6, %v2736_v10 }
 0x2e3   : > { %v2744_v11 = vpop.permute.xlu1 %2743 }
 0x2e4   : > { %v2830_v1 = vsel %vm2828_vm11, %v2827_v29, %v2744_v11 }
 0x2e5   : > { %v2833_v40 = vsel %vm2831_vm12, %v2830_v1, %v2752_v3 }
 0x2e6   : > { %v2836_v20 = vsel %vm2834_vm13, %v2833_v40, %v2760_v9 }
 0x2e7   : > { %v2839_v14 = vsel %vm2837_vm14, %v2836_v20, %v2768_v34  ;;  %v2800_v22 = vpop.permute.xlu1 %2799 }
 0x2e8   : > { %v2842_v41 = vsel %vm2840_vm15, %v2839_v14, %v2776_v50 }
 0x2e9   : > { %v2845_v0 = vsel %vm2843_vm0, %v2842_v41, %v2784_v28 }
 0x2ea   : > { %v2848_v12 = vsel %vm2846_vm1, %v2845_v0, %v2792_v15 }
 0x2eb   : > { %v2851_v21 = vsel %vm2849_vm2, %v2848_v12, %v2800_v22  ;;  %v2808_v43 = vpop.permute.xlu1 %2807 }
 0x2ec   : > { %v2854_v27 = vsel %vm2852_vm3, %v2851_v21, %v2808_v43 }
 0x2ed   : > { %2856 = vst [vmem:[%s5426_s7 + $0x8] sm:$0xff] %v2854_v27 }
 0x2ee   : > { %3789 = shalt.err (!%p3786_p5)
}
 0x2ef   : > { %s3790_s26 = scalar_lea.hbm %s5453_s13, 256  ;;  %s3794_s5 = scalar_lea.hbm %s5510_s4, 512 }
 0x2f0   : > { %p3791_p6 = scmp.ne.s32.totalorder %s5453_s13, %s3790_s26  ;;  %p3795_p10 = scmp.lt.u32.totalorder %s5453_s13, %s5510_s4 }
 0x2f1   : > { %p3796_p11 = scmp.lt.u32.totalorder %s3794_s5, %s3790_s26  ;;  %p3798_p13 = scmp.lt.u32.totalorder %s3790_s26, %s5453_s13 }
 0x2f2   : > { %p3792_p7 = pnand %p3791_p6, %p3941_p4 }
 0x2f3   : > { %p3797_p12 = por %p3796_p11, %p3795_p10 }
 0x2f4   : > { %p3793_p9 = pneg %p3792_p7 }
 0x2f5   : > { %p3799_p0 = por %p3798_p13, %p3797_p12 }
 0x2f7   : > { %p3800_p1 = pnand %p3799_p0, %p3793_p9 }
 0x2f9   : > { %3803 = shalt.err (!%p3800_p1)
}
 0x2fa   : > { %s3875_s10 = smov 128  }
 0x2fb   : > { %3438 = dma.vmem_to_hbm [thread:$0]  (%p3941_p4), %s5446_s9, 256, %s5453_s13, %s5459_s18, %s3875_s10, %s3875_s10, %s3856_s8  }
 0x2fc PF: > { %p3445_p2 = scmp.ge.s32.totalorder %s3854_s20, 2  ;;  %s2888_s11 = sand.u32 1, %s3834_s15  }
 0x2fd   : > { %s2889_s12 = scalar_lea.sflag [#allocation3], %s2888_s11 }
 0x2fe   : > { %p3441_p3 = pnand %p3445_p2, %p3948_p8 }
 0x300   : > { %3829 = dma.done.wait (!%p3441_p3), %s2889_s12, 256  }
 0x301   : > { %3831 = vsyncadd (!%p3441_p3), %s2889_s12, 4294967040  ;;  %s17_s20 = sadd.s32 1, %s3854_s20   ;;  %s5576_s15 = smov %s3838_s16 }
 0x302   : > { %p14_p5 = scmp.ge.s32.totalorder %s17_s20, 4   ;;  %s5577_s16 = smov %s3842_s17 }
 0x303   : > { %s5578_s17 = smov %s3954_s28  ;;  %s5579_s18 = smov %s3850_s19 }
 0x304   : > { %s5580_s19 = smov %s5582_s23  ;;  %16 = sbr.rel (!%p14_p5) target bundleno = 4 (0x4), region = 76 }
 0x30b   :  { %2894 = vsyncpa [#allocation3], 1 }
 0x30c   :  { %2896 = vsyncpa [#allocation3 + $0x1], 1 }

</bundles_post_ra>
